<compile_context>
chip_gen: v7x
topology: tpu7x:2x2x1
jax: 0.10.0
libtpu: 0.0.40
codegen_flags: <defaults>
</compile_context>

<pallas_src>
import numpy as np
import jax
import jax.numpy as jnp
from jax.experimental import pallas as pl
from jax.experimental.pallas import tpu as pltpu

BN_EPS = 1e-5


# ----------------------------------------------------------------------------
# Static (numpy) structure matrices.
# ----------------------------------------------------------------------------
def _interp_matrix(n_in, n_out):
    """(n_out, n_in) bilinear interpolation matrix, align_corners=True."""
    if n_in == 1:
        return np.ones((n_out, 1), np.float32)
    s = np.arange(n_out, dtype=np.float64) * (n_in - 1) / (n_out - 1)
    i0 = np.clip(np.floor(s).astype(np.int64), 0, n_in - 1)
    i1 = np.clip(i0 + 1, 0, n_in - 1)
    f = (s - i0).astype(np.float32)
    u = np.zeros((n_out, n_in), np.float32)
    u[np.arange(n_out), i0] += 1.0 - f
    u[np.arange(n_out), i1] += f
    return u


# ----------------------------------------------------------------------------
# Fused Up.forward kernel factory (shapes are closed over / static).
# ----------------------------------------------------------------------------
def _make_up_kernel(N, H, W, mid, Cout):
    inv_m = 1.0 / float(N * H * W)

    def bn_relu(z, g_ref, b_ref, pc_ref, pct_ref):
        # z: (N*H, W*C).  Training-mode BatchNorm over (N, H, W) per channel,
        # fused as the conv epilogue, then ReLU.
        zc = jnp.dot(z, pc_ref[...], preferred_element_type=jnp.float32)       # (N*H, C)
        zq = jnp.dot(z * z, pc_ref[...], preferred_element_type=jnp.float32)   # (N*H, C)
        s = jnp.sum(zc, axis=0, keepdims=True)                                 # (1, C)
        q = jnp.sum(zq, axis=0, keepdims=True)                                 # (1, C)
        mean = s * inv_m
        var = jnp.maximum(q * inv_m - mean * mean, 0.0)   # clamp f32 cancellation
        inv = jax.lax.rsqrt(var + BN_EPS)
        scale_c = g_ref[...] * inv                                             # (1, C)
        bias_c = b_ref[...] - mean * scale_c
        # broadcast per-channel scale/bias back to the (1, W*C) lane layout
        scale = jnp.dot(scale_c, pct_ref[...], preferred_element_type=jnp.float32)
        bias = jnp.dot(bias_c, pct_ref[...], preferred_element_type=jnp.float32)
        return jnp.maximum(z * scale + bias, 0.0)

    def kernel(x1_ref, x2_ref, bh_ref, bw_ref, s_ref,
               b1a_ref, b1b_ref, g1_ref, be1_ref, pc1_ref, pc1t_ref,
               b2_ref, g2_ref, be2_ref, pc2_ref, pc2t_ref, o_ref):
        f32 = jnp.float32

        # Bilinear x2 upsample (align_corners=True) + F.pad placement: two matmuls.
        x1u = jnp.dot(bh_ref[...],
                      jnp.dot(x1_ref[...], bw_ref[...], preferred_element_type=f32),
                      preferred_element_type=f32)                 # (N*H, W*Cu)
        x2v = x2_ref[...]                                         # (N*H, W*Cs)

        # conv1 on concat([x2, x1]) -> BN -> ReLU.  The channel concat is folded
        # into the split banded weights (b1a acts on x2, b1b on upsampled x1),
        # so no concat / im2col copies are needed in-kernel.
        z1 = jnp.zeros((N * H, W * mid), f32)
        for ky in range(3):
            p = (jnp.dot(x2v, b1a_ref[ky], preferred_element_type=f32) +
                 jnp.dot(x1u, b1b_ref[ky], preferred_element_type=f32))
            z1 = z1 + jnp.dot(s_ref[ky], p, preferred_element_type=f32)
        h = bn_relu(z1, g1_ref, be1_ref, pc1_ref, pc1t_ref)        # (N*H, W*mid)

        # conv2 -> BN -> ReLU.
        z2 = jnp.zeros((N * H, W * Cout), f32)
        for ky in range(3):
            p = jnp.dot(h, b2_ref[ky], preferred_element_type=f32)
            z2 = z2 + jnp.dot(s_ref[ky], p, preferred_element_type=f32)
        o_ref[...] = bn_relu(z2, g2_ref, be2_ref, pc2_ref, pc2t_ref)

    return kernel


# ----------------------------------------------------------------------------
# Wrapper: NCHW in/out, builds the static structure matrices, one pallas_call.
# ----------------------------------------------------------------------------
def _up_apply(params, x1_nchw, x2_nchw):
    w1 = params["w1"]            # (3, 3, Cs+Cu, mid)   [ky, kx, cin, cout]
    w2 = params["w2"]            # (3, 3, mid, Cout)
    gamma1 = params["g1"]
    beta1 = params["b1"]
    gamma2 = params["g2"]
    beta2 = params["b2"]

    N, Cu, H1, W1 = x1_nchw.shape           # deep feature map (to upsample)
    N2, Cs, H, W = x2_nchw.shape            # skip connection
    assert N == N2
    mid = w1.shape[-1]
    Cout = w2.shape[-1]
    Ho, Wo = 2 * H1, 2 * W1
    diffY, diffX = H - Ho, W - Wo
    assert diffY >= 0 and diffX >= 0, "x2 must be >= upsampled x1 (F.pad semantics)"
    py, px = diffY // 2, diffX // 2

    # NCHW -> channels-last, flattened to the 2-D (rows = N*H, lanes = W*C) layout.
    x1_2d = jnp.transpose(x1_nchw, (0, 2, 3, 1)).reshape(N * H1, W1 * Cu).astype(jnp.float32)
    x2_2d = jnp.transpose(x2_nchw, (0, 2, 3, 1)).reshape(N * H, W * Cs).astype(jnp.float32)

    # ---- static structure matrices (compile-time numpy constants) ----------
    uh = np.zeros((H, H1), np.float32)
    uh[py:py + Ho] = _interp_matrix(H1, Ho)          # row interp + top/bottom pad
    uw = np.zeros((W, W1), np.float32)
    uw[px:px + Wo] = _interp_matrix(W1, Wo)          # col interp + left/right pad
    bh = np.kron(np.eye(N, dtype=np.float32), uh)                    # (N*H, N*H1)
    bw = np.kron(uw.T, np.eye(Cu, dtype=np.float32))                 # (W1*Cu, W*Cu)

    # kx-band structure of a 3x3 "same" conv along W (zero pad via band truncation)
    t_kx = np.zeros((3, W, W), np.float32)
    for kx in range(3):
        for xo in range(W):
            xi = xo + kx - 1
            if 0 <= xi < W:
                t_kx[kx, xi, xo] = 1.0
    # ky row shifts along H (zero pad at per-image boundaries)
    s_ky = np.zeros((3, N * H, N * H), np.float32)
    for ky in range(3):
        for n in range(N):
            for y in range(H):
                yi = y + ky - 1
                if 0 <= yi < H:
                    s_ky[ky, n * H + y, n * H + yi] = 1.0
    # per-channel collapse (W*C -> C) and expand (C -> W*C) matrices for BN
    pc1 = np.kron(np.ones((W, 1), np.float32), np.eye(mid, dtype=np.float32))
    pc2 = np.kron(np.ones((W, 1), np.float32), np.eye(Cout, dtype=np.float32))

    # ---- weight-dependent banded matrices (tiny einsums, weight prep only) --
    tj = jnp.asarray(t_kx)
    w1a = w1[:, :, :Cs, :]       # acts on x2 (skip):     concat order is [x2, x1]
    w1b = w1[:, :, Cs:, :]       # acts on upsampled x1
    b1a = jnp.einsum("ykio,kpq->ypiqo", w1a, tj).reshape(3, W * Cs, W * mid)
    b1b = jnp.einsum("ykio,kpq->ypiqo", w1b, tj).reshape(3, W * Cu, W * mid)
    b2m = jnp.einsum("ykio,kpq->ypiqo", w2, tj).reshape(3, W * mid, W * Cout)

    kernel = _make_up_kernel(N, H, W, mid, Cout)

    def full(shape):
        return pl.BlockSpec(shape, lambda i, _s=shape: (0,) * len(_s))

    out2d = pl.pallas_call(
        kernel,
        out_shape=jax.ShapeDtypeStruct((N * H, W * Cout), jnp.float32),
        grid=(1,),
        in_specs=[
            full((N * H1, W1 * Cu)),        # x1 (flattened)
            full((N * H, W * Cs)),          # x2 (flattened)
            full((N * H, N * H1)),          # bh  (upsample rows + pad)
            full((W1 * Cu, W * Cu)),        # bw  (upsample cols + pad)
            full((3, N * H, N * H)),        # s_ky row shifts
            full((3, W * Cs, W * mid)),     # banded conv1 weights (x2 part)
            full((3, W * Cu, W * mid)),     # banded conv1 weights (x1 part)
            full((1, mid)), full((1, mid)),                 # gamma1, beta1
            full((W * mid, mid)), full((mid, W * mid)),     # pc1, pc1^T
            full((3, W * mid, W * Cout)),   # banded conv2 weights
            full((1, Cout)), full((1, Cout)),               # gamma2, beta2
            full((W * Cout, Cout)), full((Cout, W * Cout)), # pc2, pc2^T
        ],
        out_specs=full((N * H, W * Cout)),
        compiler_params=pltpu.CompilerParams(
            dimension_semantics=("arbitrary",),
            vmem_limit_bytes=32 * 1024 * 1024),
    )(x1_2d, x2_2d, jnp.asarray(bh), jnp.asarray(bw), jnp.asarray(s_ky),
      b1a, b1b,
      gamma1.reshape(1, mid), beta1.reshape(1, mid),
      jnp.asarray(pc1), jnp.asarray(pc1.T),
      b2m,
      gamma2.reshape(1, Cout), beta2.reshape(1, Cout),
      jnp.asarray(pc2), jnp.asarray(pc2.T))

    # (N*H, W*Cout) -> NCHW
    return jnp.transpose(out2d.reshape(N, H, W, Cout), (0, 3, 1, 2))


up_forward = jax.jit(_up_apply)


# ----------------------------------------------------------------------------
# Parameters (deterministic, shapes exactly as Up.__init__ with bilinear=True).
# ----------------------------------------------------------------------------
def init_up_params(key, in_channels, out_channels):
    mid = in_channels // 2
    k1, k2 = jax.random.split(key)

    def conv_w(k, cin, cout):
        bound = 1.0 / float(np.sqrt(cin * 9))
        # layout (ky, kx, cin, cout)  <->  PyTorch (cout, cin, ky, kx).transpose(2,3,1,0)
        return jax.random.uniform(k, (3, 3, cin, cout), jnp.float32,
                                  minval=-bound, maxval=bound)

    return dict(
        w1=conv_w(k1, in_channels, mid),
        g1=jnp.ones((mid,), jnp.float32),
        b1=jnp.zeros((mid,), jnp.float32),
        w2=conv_w(k2, mid, out_channels),
        g2=jnp.ones((out_channels,), jnp.float32),
        b2=jnp.zeros((out_channels,), jnp.float32),
    )


# ----------------------------------------------------------------------------
# Pure-JAX reference of Up.forward (for correctness checking only).
# ----------------------------------------------------------------------------
def _bilinear_up_ref(x):
    N, H, W, C = x.shape
    Ho, Wo = 2 * H, 2 * W

    def coords(n_in, n_out):
        if n_in == 1:
            z = jnp.zeros((n_out,), jnp.int32)
            return z, z, jnp.zeros((n_out,), jnp.float32)
        s = jnp.arange(n_out, dtype=jnp.float32) * (n_in - 1) / (n_out - 1)
        i0 = jnp.clip(jnp.floor(s).astype(jnp.int32), 0, n_in - 1)
        i1 = jnp.clip(i0 + 1, 0, n_in - 1)
        return i0, i1, s - i0.astype(jnp.float32)

    y0, y1, wy = coords(H, Ho)
    x0, x1, wx = coords(W, Wo)
    wy = wy[None, :, None, None]
    wx = wx[None, None, :, None]
    r0 = x[:, y0]
    r1 = x[:, y1]
    top = r0[:, :, x0] * (1.0 - wx) + r0[:, :, x1] * wx
    bot = r1[:, :, x0] * (1.0 - wx) + r1[:, :, x1] * wx
    return top * (1.0 - wy) + bot * wy


def _reference_up(params, x1_nchw, x2_nchw):
    x1 = jnp.transpose(x1_nchw, (0, 2, 3, 1)).astype(jnp.float32)
    x2 = jnp.transpose(x2_nchw, (0, 2, 3, 1)).astype(jnp.float32)
    x1 = _bilinear_up_ref(x1)
    dY = x2.shape[1] - x1.shape[1]
    dX = x2.shape[2] - x1.shape[2]
    x1 = jnp.pad(x1, ((0, 0), (dY // 2, dY - dY // 2), (dX // 2, dX - dX // 2), (0, 0)))
    x = jnp.concatenate([x2, x1], axis=-1)

    def conv_bn_relu(x, w, g, b):
        y = jax.lax.conv_general_dilated(
            x, w, window_strides=(1, 1), padding="SAME",
            dimension_numbers=("NHWC", "HWIO", "NHWC"))
        mean = jnp.mean(y, axis=(0, 1, 2))
        var = jnp.mean((y - mean) ** 2, axis=(0, 1, 2))
        y = (y - mean) * jax.lax.rsqrt(var + BN_EPS) * g + b
        return jnp.maximum(y, 0.0)

    h = conv_bn_relu(x, params["w1"], params["g1"], params["b1"])
    h = conv_bn_relu(h, params["w2"], params["g2"], params["b2"])
    return jnp.transpose(h, (0, 3, 1, 2))


if __name__ == "__main__":
    key = jax.random.PRNGKey(0)
    kp, kx1, kx2 = jax.random.split(key, 3)

    in_channels, out_channels = 8, 4          # concat channels = 8, mid = 4
    params = init_up_params(kp, in_channels, out_channels)

    # x1: deeper feature map (NCHW), x2: skip connection (NCHW)
    x1 = jax.random.normal(kx1, (2, in_channels // 2, 8, 8), jnp.float32)
    x2 = jax.random.normal(kx2, (2, in_channels // 2, 16, 16), jnp.float32)

    out = up_forward(params, x1, x2)
    jax.block_until_ready(out)
    assert out.shape == (2, out_channels, 16, 16)

    ref = jax.jit(_reference_up)(params, x1, x2)
    err = float(jnp.max(jnp.abs(out - ref)))
    assert err < 1e-3, f"kernel/reference mismatch: max abs err = {err}"
    assert bool(jnp.all(jnp.isfinite(out)))
    print("KERNEL_OK")
</pallas_src>

<mosaic_0001>
module attributes {stable_mosaic.version = 11 : i64} {
  func.func @kernel(%arg0: i32, %arg1: memref<16x32xf32, #tpu.memory_space<vmem>>, %arg2: memref<32x64xf32, #tpu.memory_space<vmem>>, %arg3: memref<32x16xf32, #tpu.memory_space<vmem>>, %arg4: memref<32x64xf32, #tpu.memory_space<vmem>>, %arg5: memref<3x32x32xf32, #tpu.memory_space<vmem>>, %arg6: memref<3x64x64xf32, #tpu.memory_space<vmem>>, %arg7: memref<3x64x64xf32, #tpu.memory_space<vmem>>, %arg8: memref<1x4xf32, #tpu.memory_space<vmem>>, %arg9: memref<1x4xf32, #tpu.memory_space<vmem>>, %arg10: memref<64x4xf32, #tpu.memory_space<vmem>>, %arg11: memref<4x64xf32, #tpu.memory_space<vmem>>, %arg12: memref<3x64x64xf32, #tpu.memory_space<vmem>>, %arg13: memref<1x4xf32, #tpu.memory_space<vmem>>, %arg14: memref<1x4xf32, #tpu.memory_space<vmem>>, %arg15: memref<64x4xf32, #tpu.memory_space<vmem>>, %arg16: memref<4x64xf32, #tpu.memory_space<vmem>>, %arg17: memref<32x64xf32, #tpu.memory_space<vmem>>) attributes {dimension_semantics = [#tpu.dimension_semantics<arbitrary>], iteration_bounds = array<i64: 1>, scalar_prefetch = 0 : i64, scratch_operands = 0 : i64, tpu.core_type = #tpu.core_type<tc>, window_params = [{pipeline_mode = #tpu.pipeline_mode<synchronous>, transform_indices = @transform_0, window_bounds = array<i64: 16, 32>}, {pipeline_mode = #tpu.pipeline_mode<synchronous>, transform_indices = @transform_1, window_bounds = array<i64: 32, 64>}, {pipeline_mode = #tpu.pipeline_mode<synchronous>, transform_indices = @transform_2, window_bounds = array<i64: 32, 16>}, {pipeline_mode = #tpu.pipeline_mode<synchronous>, transform_indices = @transform_3, window_bounds = array<i64: 32, 64>}, {pipeline_mode = #tpu.pipeline_mode<synchronous>, transform_indices = @transform_4, window_bounds = array<i64: 3, 32, 32>}, {pipeline_mode = #tpu.pipeline_mode<synchronous>, transform_indices = @transform_5, window_bounds = array<i64: 3, 64, 64>}, {pipeline_mode = #tpu.pipeline_mode<synchronous>, transform_indices = @transform_6, window_bounds = array<i64: 3, 64, 64>}, {pipeline_mode = #tpu.pipeline_mode<synchronous>, transform_indices = @transform_7, window_bounds = array<i64: 1, 4>}, {pipeline_mode = #tpu.pipeline_mode<synchronous>, transform_indices = @transform_8, window_bounds = array<i64: 1, 4>}, {pipeline_mode = #tpu.pipeline_mode<synchronous>, transform_indices = @transform_9, window_bounds = array<i64: 64, 4>}, {pipeline_mode = #tpu.pipeline_mode<synchronous>, transform_indices = @transform_10, window_bounds = array<i64: 4, 64>}, {pipeline_mode = #tpu.pipeline_mode<synchronous>, transform_indices = @transform_11, window_bounds = array<i64: 3, 64, 64>}, {pipeline_mode = #tpu.pipeline_mode<synchronous>, transform_indices = @transform_12, window_bounds = array<i64: 1, 4>}, {pipeline_mode = #tpu.pipeline_mode<synchronous>, transform_indices = @transform_13, window_bounds = array<i64: 1, 4>}, {pipeline_mode = #tpu.pipeline_mode<synchronous>, transform_indices = @transform_14, window_bounds = array<i64: 64, 4>}, {pipeline_mode = #tpu.pipeline_mode<synchronous>, transform_indices = @transform_15, window_bounds = array<i64: 4, 64>}, {pipeline_mode = #tpu.pipeline_mode<synchronous>, transform_indices = @transform_16, window_bounds = array<i64: 32, 64>}]} {
    %c0 = arith.constant 0 : index
    %c0_0 = arith.constant 0 : index
    %0 = vector.load %arg3[%c0, %c0_0] : memref<32x16xf32, #tpu.memory_space<vmem>>, vector<32x16xf32>
    %c0_1 = arith.constant 0 : index
    %c0_2 = arith.constant 0 : index
    %1 = vector.load %arg1[%c0_1, %c0_2] : memref<16x32xf32, #tpu.memory_space<vmem>>, vector<16x32xf32>
    %c0_3 = arith.constant 0 : index
    %c0_4 = arith.constant 0 : index
    %2 = vector.load %arg4[%c0_3, %c0_4] : memref<32x64xf32, #tpu.memory_space<vmem>>, vector<32x64xf32>
    %cst = arith.constant dense<0.000000e+00> : vector<16x64xf32>
    %3 = tpu.matmul %1, %2, %cst {dimension_numbers = #tpu.dot_dimension_numbers<[1], [0], [0], [1], [0, 0, 1, 1], [], []>} : vector<16x32xf32>, vector<32x64xf32>, vector<16x64xf32> -> vector<16x64xf32>
    %cst_5 = arith.constant dense<0.000000e+00> : vector<32x64xf32>
    %4 = tpu.matmul %0, %3, %cst_5 {dimension_numbers = #tpu.dot_dimension_numbers<[1], [0], [0], [1], [0, 0, 1, 1], [], []>} : vector<32x16xf32>, vector<16x64xf32>, vector<32x64xf32> -> vector<32x64xf32>
    %c0_6 = arith.constant 0 : index
    %c0_7 = arith.constant 0 : index
    %5 = vector.load %arg2[%c0_6, %c0_7] : memref<32x64xf32, #tpu.memory_space<vmem>>, vector<32x64xf32>
    %cst_8 = arith.constant 0.000000e+00 : f32
    %6 = vector.broadcast %cst_8 : f32 to vector<32x64xf32>
    %c0_9 = arith.constant 0 : index
    %c0_10 = arith.constant 0 : index
    %c0_11 = arith.constant 0 : index
    %7 = vector.load %arg6[%c0_9, %c0_10, %c0_11] : memref<3x64x64xf32, #tpu.memory_space<vmem>>, vector<1x64x64xf32>
    %8 = vector.shape_cast %7 : vector<1x64x64xf32> to vector<64x64xf32>
    %cst_12 = arith.constant dense<0.000000e+00> : vector<32x64xf32>
    %9 = tpu.matmul %5, %8, %cst_12 {dimension_numbers = #tpu.dot_dimension_numbers<[1], [0], [0], [1], [0, 0, 1, 1], [], []>} : vector<32x64xf32>, vector<64x64xf32>, vector<32x64xf32> -> vector<32x64xf32>
    %c0_13 = arith.constant 0 : index
    %c0_14 = arith.constant 0 : index
    %c0_15 = arith.constant 0 : index
    %10 = vector.load %arg7[%c0_13, %c0_14, %c0_15] : memref<3x64x64xf32, #tpu.memory_space<vmem>>, vector<1x64x64xf32>
    %11 = vector.shape_cast %10 : vector<1x64x64xf32> to vector<64x64xf32>
    %cst_16 = arith.constant dense<0.000000e+00> : vector<32x64xf32>
    %12 = tpu.matmul %4, %11, %cst_16 {dimension_numbers = #tpu.dot_dimension_numbers<[1], [0], [0], [1], [0, 0, 1, 1], [], []>} : vector<32x64xf32>, vector<64x64xf32>, vector<32x64xf32> -> vector<32x64xf32>
    %13 = arith.addf %9, %12 : vector<32x64xf32>
    %c0_17 = arith.constant 0 : index
    %c0_18 = arith.constant 0 : index
    %c0_19 = arith.constant 0 : index
    %14 = vector.load %arg5[%c0_17, %c0_18, %c0_19] : memref<3x32x32xf32, #tpu.memory_space<vmem>>, vector<1x32x32xf32>
    %15 = vector.shape_cast %14 : vector<1x32x32xf32> to vector<32x32xf32>
    %cst_20 = arith.constant dense<0.000000e+00> : vector<32x64xf32>
    %16 = tpu.matmul %15, %13, %cst_20 {dimension_numbers = #tpu.dot_dimension_numbers<[1], [0], [0], [1], [0, 0, 1, 1], [], []>} : vector<32x32xf32>, vector<32x64xf32>, vector<32x64xf32> -> vector<32x64xf32>
    %17 = arith.addf %6, %16 : vector<32x64xf32>
    %c1 = arith.constant 1 : index
    %c0_21 = arith.constant 0 : index
    %c0_22 = arith.constant 0 : index
    %18 = vector.load %arg6[%c1, %c0_21, %c0_22] : memref<3x64x64xf32, #tpu.memory_space<vmem>>, vector<1x64x64xf32>
    %19 = vector.shape_cast %18 : vector<1x64x64xf32> to vector<64x64xf32>
    %cst_23 = arith.constant dense<0.000000e+00> : vector<32x64xf32>
    %20 = tpu.matmul %5, %19, %cst_23 {dimension_numbers = #tpu.dot_dimension_numbers<[1], [0], [0], [1], [0, 0, 1, 1], [], []>} : vector<32x64xf32>, vector<64x64xf32>, vector<32x64xf32> -> vector<32x64xf32>
    %c1_24 = arith.constant 1 : index
    %c0_25 = arith.constant 0 : index
    %c0_26 = arith.constant 0 : index
    %21 = vector.load %arg7[%c1_24, %c0_25, %c0_26] : memref<3x64x64xf32, #tpu.memory_space<vmem>>, vector<1x64x64xf32>
    %22 = vector.shape_cast %21 : vector<1x64x64xf32> to vector<64x64xf32>
    %cst_27 = arith.constant dense<0.000000e+00> : vector<32x64xf32>
    %23 = tpu.matmul %4, %22, %cst_27 {dimension_numbers = #tpu.dot_dimension_numbers<[1], [0], [0], [1], [0, 0, 1, 1], [], []>} : vector<32x64xf32>, vector<64x64xf32>, vector<32x64xf32> -> vector<32x64xf32>
    %24 = arith.addf %20, %23 : vector<32x64xf32>
    %c1_28 = arith.constant 1 : index
    %c0_29 = arith.constant 0 : index
    %c0_30 = arith.constant 0 : index
    %25 = vector.load %arg5[%c1_28, %c0_29, %c0_30] : memref<3x32x32xf32, #tpu.memory_space<vmem>>, vector<1x32x32xf32>
    %26 = vector.shape_cast %25 : vector<1x32x32xf32> to vector<32x32xf32>
    %cst_31 = arith.constant dense<0.000000e+00> : vector<32x64xf32>
    %27 = tpu.matmul %26, %24, %cst_31 {dimension_numbers = #tpu.dot_dimension_numbers<[1], [0], [0], [1], [0, 0, 1, 1], [], []>} : vector<32x32xf32>, vector<32x64xf32>, vector<32x64xf32> -> vector<32x64xf32>
    %28 = arith.addf %17, %27 : vector<32x64xf32>
    %c2 = arith.constant 2 : index
    %c0_32 = arith.constant 0 : index
    %c0_33 = arith.constant 0 : index
    %29 = vector.load %arg6[%c2, %c0_32, %c0_33] : memref<3x64x64xf32, #tpu.memory_space<vmem>>, vector<1x64x64xf32>
    %30 = vector.shape_cast %29 : vector<1x64x64xf32> to vector<64x64xf32>
    %cst_34 = arith.constant dense<0.000000e+00> : vector<32x64xf32>
    %31 = tpu.matmul %5, %30, %cst_34 {dimension_numbers = #tpu.dot_dimension_numbers<[1], [0], [0], [1], [0, 0, 1, 1], [], []>} : vector<32x64xf32>, vector<64x64xf32>, vector<32x64xf32> -> vector<32x64xf32>
    %c2_35 = arith.constant 2 : index
    %c0_36 = arith.constant 0 : index
    %c0_37 = arith.constant 0 : index
    %32 = vector.load %arg7[%c2_35, %c0_36, %c0_37] : memref<3x64x64xf32, #tpu.memory_space<vmem>>, vector<1x64x64xf32>
    %33 = vector.shape_cast %32 : vector<1x64x64xf32> to vector<64x64xf32>
    %cst_38 = arith.constant dense<0.000000e+00> : vector<32x64xf32>
    %34 = tpu.matmul %4, %33, %cst_38 {dimension_numbers = #tpu.dot_dimension_numbers<[1], [0], [0], [1], [0, 0, 1, 1], [], []>} : vector<32x64xf32>, vector<64x64xf32>, vector<32x64xf32> -> vector<32x64xf32>
    %35 = arith.addf %31, %34 : vector<32x64xf32>
    %c2_39 = arith.constant 2 : index
    %c0_40 = arith.constant 0 : index
    %c0_41 = arith.constant 0 : index
    %36 = vector.load %arg5[%c2_39, %c0_40, %c0_41] : memref<3x32x32xf32, #tpu.memory_space<vmem>>, vector<1x32x32xf32>
    %37 = vector.shape_cast %36 : vector<1x32x32xf32> to vector<32x32xf32>
    %cst_42 = arith.constant dense<0.000000e+00> : vector<32x64xf32>
    %38 = tpu.matmul %37, %35, %cst_42 {dimension_numbers = #tpu.dot_dimension_numbers<[1], [0], [0], [1], [0, 0, 1, 1], [], []>} : vector<32x32xf32>, vector<32x64xf32>, vector<32x64xf32> -> vector<32x64xf32>
    %39 = arith.addf %28, %38 : vector<32x64xf32>
    %c0_43 = arith.constant 0 : index
    %c0_44 = arith.constant 0 : index
    %40 = vector.load %arg10[%c0_43, %c0_44] : memref<64x4xf32, #tpu.memory_space<vmem>>, vector<64x4xf32>
    %cst_45 = arith.constant dense<0.000000e+00> : vector<32x4xf32>
    %41 = tpu.matmul %39, %40, %cst_45 {dimension_numbers = #tpu.dot_dimension_numbers<[1], [0], [0], [1], [0, 0, 1, 1], [], []>} : vector<32x64xf32>, vector<64x4xf32>, vector<32x4xf32> -> vector<32x4xf32>
    %42 = arith.mulf %39, %39 : vector<32x64xf32>
    %c0_46 = arith.constant 0 : index
    %c0_47 = arith.constant 0 : index
    %43 = vector.load %arg10[%c0_46, %c0_47] : memref<64x4xf32, #tpu.memory_space<vmem>>, vector<64x4xf32>
    %cst_48 = arith.constant dense<0.000000e+00> : vector<32x4xf32>
    %44 = tpu.matmul %42, %43, %cst_48 {dimension_numbers = #tpu.dot_dimension_numbers<[1], [0], [0], [1], [0, 0, 1, 1], [], []>} : vector<32x64xf32>, vector<64x4xf32>, vector<32x4xf32> -> vector<32x4xf32>
    %cst_49 = arith.constant dense<0.000000e+00> : vector<4xf32>
    %45 = vector.multi_reduction <add>, %41, %cst_49 [0] : vector<32x4xf32> to vector<4xf32>
    %46 = vector.shape_cast %45 : vector<4xf32> to vector<1x4xf32>
    %cst_50 = arith.constant dense<0.000000e+00> : vector<4xf32>
    %47 = vector.multi_reduction <add>, %44, %cst_50 [0] : vector<32x4xf32> to vector<4xf32>
    %48 = vector.shape_cast %47 : vector<4xf32> to vector<1x4xf32>
    %cst_51 = arith.constant 0.001953125 : f32
    %49 = vector.broadcast %cst_51 : f32 to vector<1x4xf32>
    %50 = arith.mulf %46, %49 : vector<1x4xf32>
    %cst_52 = arith.constant 0.001953125 : f32
    %51 = vector.broadcast %cst_52 : f32 to vector<1x4xf32>
    %52 = arith.mulf %48, %51 : vector<1x4xf32>
    %53 = arith.mulf %50, %50 : vector<1x4xf32>
    %54 = arith.subf %52, %53 : vector<1x4xf32>
    %cst_53 = arith.constant 0.000000e+00 : f32
    %55 = vector.broadcast %cst_53 : f32 to vector<1x4xf32>
    %56 = arith.maximumf %54, %55 : vector<1x4xf32>
    %cst_54 = arith.constant 9.99999974E-6 : f32
    %57 = vector.broadcast %cst_54 : f32 to vector<1x4xf32>
    %58 = arith.addf %56, %57 : vector<1x4xf32>
    %59 = math.rsqrt %58 : vector<1x4xf32>
    %c0_55 = arith.constant 0 : index
    %c0_56 = arith.constant 0 : index
    %60 = vector.load %arg8[%c0_55, %c0_56] : memref<1x4xf32, #tpu.memory_space<vmem>>, vector<1x4xf32>
    %61 = arith.mulf %60, %59 : vector<1x4xf32>
    %c0_57 = arith.constant 0 : index
    %c0_58 = arith.constant 0 : index
    %62 = vector.load %arg9[%c0_57, %c0_58] : memref<1x4xf32, #tpu.memory_space<vmem>>, vector<1x4xf32>
    %63 = arith.mulf %50, %61 : vector<1x4xf32>
    %64 = arith.subf %62, %63 : vector<1x4xf32>
    %c0_59 = arith.constant 0 : index
    %c0_60 = arith.constant 0 : index
    %65 = vector.load %arg11[%c0_59, %c0_60] : memref<4x64xf32, #tpu.memory_space<vmem>>, vector<4x64xf32>
    %cst_61 = arith.constant dense<0.000000e+00> : vector<1x64xf32>
    %66 = tpu.matmul %61, %65, %cst_61 {dimension_numbers = #tpu.dot_dimension_numbers<[1], [0], [0], [1], [0, 0, 1, 1], [], []>} : vector<1x4xf32>, vector<4x64xf32>, vector<1x64xf32> -> vector<1x64xf32>
    %c0_62 = arith.constant 0 : index
    %c0_63 = arith.constant 0 : index
    %67 = vector.load %arg11[%c0_62, %c0_63] : memref<4x64xf32, #tpu.memory_space<vmem>>, vector<4x64xf32>
    %cst_64 = arith.constant dense<0.000000e+00> : vector<1x64xf32>
    %68 = tpu.matmul %64, %67, %cst_64 {dimension_numbers = #tpu.dot_dimension_numbers<[1], [0], [0], [1], [0, 0, 1, 1], [], []>} : vector<1x4xf32>, vector<4x64xf32>, vector<1x64xf32> -> vector<1x64xf32>
    %69 = vector.broadcast %66 : vector<1x64xf32> to vector<32x64xf32>
    %70 = arith.mulf %39, %69 : vector<32x64xf32>
    %71 = vector.broadcast %68 : vector<1x64xf32> to vector<32x64xf32>
    %72 = arith.addf %70, %71 : vector<32x64xf32>
    %cst_65 = arith.constant 0.000000e+00 : f32
    %73 = vector.broadcast %cst_65 : f32 to vector<32x64xf32>
    %74 = arith.maximumf %72, %73 : vector<32x64xf32>
    %cst_66 = arith.constant 0.000000e+00 : f32
    %75 = vector.broadcast %cst_66 : f32 to vector<32x64xf32>
    %c0_67 = arith.constant 0 : index
    %c0_68 = arith.constant 0 : index
    %c0_69 = arith.constant 0 : index
    %76 = vector.load %arg12[%c0_67, %c0_68, %c0_69] : memref<3x64x64xf32, #tpu.memory_space<vmem>>, vector<1x64x64xf32>
    %77 = vector.shape_cast %76 : vector<1x64x64xf32> to vector<64x64xf32>
    %cst_70 = arith.constant dense<0.000000e+00> : vector<32x64xf32>
    %78 = tpu.matmul %74, %77, %cst_70 {dimension_numbers = #tpu.dot_dimension_numbers<[1], [0], [0], [1], [0, 0, 1, 1], [], []>} : vector<32x64xf32>, vector<64x64xf32>, vector<32x64xf32> -> vector<32x64xf32>
    %c0_71 = arith.constant 0 : index
    %c0_72 = arith.constant 0 : index
    %c0_73 = arith.constant 0 : index
    %79 = vector.load %arg5[%c0_71, %c0_72, %c0_73] : memref<3x32x32xf32, #tpu.memory_space<vmem>>, vector<1x32x32xf32>
    %80 = vector.shape_cast %79 : vector<1x32x32xf32> to vector<32x32xf32>
    %cst_74 = arith.constant dense<0.000000e+00> : vector<32x64xf32>
    %81 = tpu.matmul %80, %78, %cst_74 {dimension_numbers = #tpu.dot_dimension_numbers<[1], [0], [0], [1], [0, 0, 1, 1], [], []>} : vector<32x32xf32>, vector<32x64xf32>, vector<32x64xf32> -> vector<32x64xf32>
    %82 = arith.addf %75, %81 : vector<32x64xf32>
    %c1_75 = arith.constant 1 : index
    %c0_76 = arith.constant 0 : index
    %c0_77 = arith.constant 0 : index
    %83 = vector.load %arg12[%c1_75, %c0_76, %c0_77] : memref<3x64x64xf32, #tpu.memory_space<vmem>>, vector<1x64x64xf32>
    %84 = vector.shape_cast %83 : vector<1x64x64xf32> to vector<64x64xf32>
    %cst_78 = arith.constant dense<0.000000e+00> : vector<32x64xf32>
    %85 = tpu.matmul %74, %84, %cst_78 {dimension_numbers = #tpu.dot_dimension_numbers<[1], [0], [0], [1], [0, 0, 1, 1], [], []>} : vector<32x64xf32>, vector<64x64xf32>, vector<32x64xf32> -> vector<32x64xf32>
    %c1_79 = arith.constant 1 : index
    %c0_80 = arith.constant 0 : index
    %c0_81 = arith.constant 0 : index
    %86 = vector.load %arg5[%c1_79, %c0_80, %c0_81] : memref<3x32x32xf32, #tpu.memory_space<vmem>>, vector<1x32x32xf32>
    %87 = vector.shape_cast %86 : vector<1x32x32xf32> to vector<32x32xf32>
    %cst_82 = arith.constant dense<0.000000e+00> : vector<32x64xf32>
    %88 = tpu.matmul %87, %85, %cst_82 {dimension_numbers = #tpu.dot_dimension_numbers<[1], [0], [0], [1], [0, 0, 1, 1], [], []>} : vector<32x32xf32>, vector<32x64xf32>, vector<32x64xf32> -> vector<32x64xf32>
    %89 = arith.addf %82, %88 : vector<32x64xf32>
    %c2_83 = arith.constant 2 : index
    %c0_84 = arith.constant 0 : index
    %c0_85 = arith.constant 0 : index
    %90 = vector.load %arg12[%c2_83, %c0_84, %c0_85] : memref<3x64x64xf32, #tpu.memory_space<vmem>>, vector<1x64x64xf32>
    %91 = vector.shape_cast %90 : vector<1x64x64xf32> to vector<64x64xf32>
    %cst_86 = arith.constant dense<0.000000e+00> : vector<32x64xf32>
    %92 = tpu.matmul %74, %91, %cst_86 {dimension_numbers = #tpu.dot_dimension_numbers<[1], [0], [0], [1], [0, 0, 1, 1], [], []>} : vector<32x64xf32>, vector<64x64xf32>, vector<32x64xf32> -> vector<32x64xf32>
    %c2_87 = arith.constant 2 : index
    %c0_88 = arith.constant 0 : index
    %c0_89 = arith.constant 0 : index
    %93 = vector.load %arg5[%c2_87, %c0_88, %c0_89] : memref<3x32x32xf32, #tpu.memory_space<vmem>>, vector<1x32x32xf32>
    %94 = vector.shape_cast %93 : vector<1x32x32xf32> to vector<32x32xf32>
    %cst_90 = arith.constant dense<0.000000e+00> : vector<32x64xf32>
    %95 = tpu.matmul %94, %92, %cst_90 {dimension_numbers = #tpu.dot_dimension_numbers<[1], [0], [0], [1], [0, 0, 1, 1], [], []>} : vector<32x32xf32>, vector<32x64xf32>, vector<32x64xf32> -> vector<32x64xf32>
    %96 = arith.addf %89, %95 : vector<32x64xf32>
    %c0_91 = arith.constant 0 : index
    %c0_92 = arith.constant 0 : index
    %97 = vector.load %arg15[%c0_91, %c0_92] : memref<64x4xf32, #tpu.memory_space<vmem>>, vector<64x4xf32>
    %cst_93 = arith.constant dense<0.000000e+00> : vector<32x4xf32>
    %98 = tpu.matmul %96, %97, %cst_93 {dimension_numbers = #tpu.dot_dimension_numbers<[1], [0], [0], [1], [0, 0, 1, 1], [], []>} : vector<32x64xf32>, vector<64x4xf32>, vector<32x4xf32> -> vector<32x4xf32>
    %99 = arith.mulf %96, %96 : vector<32x64xf32>
    %c0_94 = arith.constant 0 : index
    %c0_95 = arith.constant 0 : index
    %100 = vector.load %arg15[%c0_94, %c0_95] : memref<64x4xf32, #tpu.memory_space<vmem>>, vector<64x4xf32>
    %cst_96 = arith.constant dense<0.000000e+00> : vector<32x4xf32>
    %101 = tpu.matmul %99, %100, %cst_96 {dimension_numbers = #tpu.dot_dimension_numbers<[1], [0], [0], [1], [0, 0, 1, 1], [], []>} : vector<32x64xf32>, vector<64x4xf32>, vector<32x4xf32> -> vector<32x4xf32>
    %cst_97 = arith.constant dense<0.000000e+00> : vector<4xf32>
    %102 = vector.multi_reduction <add>, %98, %cst_97 [0] : vector<32x4xf32> to vector<4xf32>
    %103 = vector.shape_cast %102 : vector<4xf32> to vector<1x4xf32>
    %cst_98 = arith.constant dense<0.000000e+00> : vector<4xf32>
    %104 = vector.multi_reduction <add>, %101, %cst_98 [0] : vector<32x4xf32> to vector<4xf32>
    %105 = vector.shape_cast %104 : vector<4xf32> to vector<1x4xf32>
    %cst_99 = arith.constant 0.001953125 : f32
    %106 = vector.broadcast %cst_99 : f32 to vector<1x4xf32>
    %107 = arith.mulf %103, %106 : vector<1x4xf32>
    %cst_100 = arith.constant 0.001953125 : f32
    %108 = vector.broadcast %cst_100 : f32 to vector<1x4xf32>
    %109 = arith.mulf %105, %108 : vector<1x4xf32>
    %110 = arith.mulf %107, %107 : vector<1x4xf32>
    %111 = arith.subf %109, %110 : vector<1x4xf32>
    %cst_101 = arith.constant 0.000000e+00 : f32
    %112 = vector.broadcast %cst_101 : f32 to vector<1x4xf32>
    %113 = arith.maximumf %111, %112 : vector<1x4xf32>
    %cst_102 = arith.constant 9.99999974E-6 : f32
    %114 = vector.broadcast %cst_102 : f32 to vector<1x4xf32>
    %115 = arith.addf %113, %114 : vector<1x4xf32>
    %116 = math.rsqrt %115 : vector<1x4xf32>
    %c0_103 = arith.constant 0 : index
    %c0_104 = arith.constant 0 : index
    %117 = vector.load %arg13[%c0_103, %c0_104] : memref<1x4xf32, #tpu.memory_space<vmem>>, vector<1x4xf32>
    %118 = arith.mulf %117, %116 : vector<1x4xf32>
    %c0_105 = arith.constant 0 : index
    %c0_106 = arith.constant 0 : index
    %119 = vector.load %arg14[%c0_105, %c0_106] : memref<1x4xf32, #tpu.memory_space<vmem>>, vector<1x4xf32>
    %120 = arith.mulf %107, %118 : vector<1x4xf32>
    %121 = arith.subf %119, %120 : vector<1x4xf32>
    %c0_107 = arith.constant 0 : index
    %c0_108 = arith.constant 0 : index
    %122 = vector.load %arg16[%c0_107, %c0_108] : memref<4x64xf32, #tpu.memory_space<vmem>>, vector<4x64xf32>
    %cst_109 = arith.constant dense<0.000000e+00> : vector<1x64xf32>
    %123 = tpu.matmul %118, %122, %cst_109 {dimension_numbers = #tpu.dot_dimension_numbers<[1], [0], [0], [1], [0, 0, 1, 1], [], []>} : vector<1x4xf32>, vector<4x64xf32>, vector<1x64xf32> -> vector<1x64xf32>
    %c0_110 = arith.constant 0 : index
    %c0_111 = arith.constant 0 : index
    %124 = vector.load %arg16[%c0_110, %c0_111] : memref<4x64xf32, #tpu.memory_space<vmem>>, vector<4x64xf32>
    %cst_112 = arith.constant dense<0.000000e+00> : vector<1x64xf32>
    %125 = tpu.matmul %121, %124, %cst_112 {dimension_numbers = #tpu.dot_dimension_numbers<[1], [0], [0], [1], [0, 0, 1, 1], [], []>} : vector<1x4xf32>, vector<4x64xf32>, vector<1x64xf32> -> vector<1x64xf32>
    %126 = vector.broadcast %123 : vector<1x64xf32> to vector<32x64xf32>
    %127 = arith.mulf %96, %126 : vector<32x64xf32>
    %128 = vector.broadcast %125 : vector<1x64xf32> to vector<32x64xf32>
    %129 = arith.addf %127, %128 : vector<32x64xf32>
    %cst_113 = arith.constant 0.000000e+00 : f32
    %130 = vector.broadcast %cst_113 : f32 to vector<32x64xf32>
    %131 = arith.maximumf %129, %130 : vector<32x64xf32>
    %c0_114 = arith.constant 0 : index
    %c0_115 = arith.constant 0 : index
    %132 = vector.load %arg17[%c0_114, %c0_115] : memref<32x64xf32, #tpu.memory_space<vmem>>, vector<32x64xf32>
    tpu.vector_store %arg17[%c0_114, %c0_115], %131 {strides = array<i32>} : memref<32x64xf32, #tpu.memory_space<vmem>>, vector<32x64xf32>,
    return
  }
  func.func @transform_0(%arg0: i32) -> (i32, i32) {
    %c0_i32 = arith.constant 0 : i32
    %c0_i32_0 = arith.constant 0 : i32
    %c0_i32_1 = arith.constant 0 : i32
    return %c0_i32, %c0_i32_0 : i32, i32
  }
  func.func @transform_1(%arg0: i32) -> (i32, i32) {
    %c0_i32 = arith.constant 0 : i32
    %c0_i32_0 = arith.constant 0 : i32
    %c0_i32_1 = arith.constant 0 : i32
    return %c0_i32, %c0_i32_0 : i32, i32
  }
  func.func @transform_2(%arg0: i32) -> (i32, i32) {
    %c0_i32 = arith.constant 0 : i32
    %c0_i32_0 = arith.constant 0 : i32
    %c0_i32_1 = arith.constant 0 : i32
    return %c0_i32, %c0_i32_0 : i32, i32
  }
  func.func @transform_3(%arg0: i32) -> (i32, i32) {
    %c0_i32 = arith.constant 0 : i32
    %c0_i32_0 = arith.constant 0 : i32
    %c0_i32_1 = arith.constant 0 : i32
    return %c0_i32, %c0_i32_0 : i32, i32
  }
  func.func @transform_4(%arg0: i32) -> (i32, i32, i32) {
    %c0_i32 = arith.constant 0 : i32
    %c0_i32_0 = arith.constant 0 : i32
    %c0_i32_1 = arith.constant 0 : i32
    %c0_i32_2 = arith.constant 0 : i32
    return %c0_i32, %c0_i32_0, %c0_i32_1 : i32, i32, i32
  }
  func.func @transform_5(%arg0: i32) -> (i32, i32, i32) {
    %c0_i32 = arith.constant 0 : i32
    %c0_i32_0 = arith.constant 0 : i32
    %c0_i32_1 = arith.constant 0 : i32
    %c0_i32_2 = arith.constant 0 : i32
    return %c0_i32, %c0_i32_0, %c0_i32_1 : i32, i32, i32
  }
  func.func @transform_6(%arg0: i32) -> (i32, i32, i32) {
    %c0_i32 = arith.constant 0 : i32
    %c0_i32_0 = arith.constant 0 : i32
    %c0_i32_1 = arith.constant 0 : i32
    %c0_i32_2 = arith.constant 0 : i32
    return %c0_i32, %c0_i32_0, %c0_i32_1 : i32, i32, i32
  }
  func.func @transform_7(%arg0: i32) -> (i32, i32) {
    %c0_i32 = arith.constant 0 : i32
    %c0_i32_0 = arith.constant 0 : i32
    %c0_i32_1 = arith.constant 0 : i32
    return %c0_i32, %c0_i32_0 : i32, i32
  }
  func.func @transform_8(%arg0: i32) -> (i32, i32) {
    %c0_i32 = arith.constant 0 : i32
    %c0_i32_0 = arith.constant 0 : i32
    %c0_i32_1 = arith.constant 0 : i32
    return %c0_i32, %c0_i32_0 : i32, i32
  }
  func.func @transform_9(%arg0: i32) -> (i32, i32) {
    %c0_i32 = arith.constant 0 : i32
    %c0_i32_0 = arith.constant 0 : i32
    %c0_i32_1 = arith.constant 0 : i32
    return %c0_i32, %c0_i32_0 : i32, i32
  }
  func.func @transform_10(%arg0: i32) -> (i32, i32) {
    %c0_i32 = arith.constant 0 : i32
    %c0_i32_0 = arith.constant 0 : i32
    %c0_i32_1 = arith.constant 0 : i32
    return %c0_i32, %c0_i32_0 : i32, i32
  }
  func.func @transform_11(%arg0: i32) -> (i32, i32, i32) {
    %c0_i32 = arith.constant 0 : i32
    %c0_i32_0 = arith.constant 0 : i32
    %c0_i32_1 = arith.constant 0 : i32
    %c0_i32_2 = arith.constant 0 : i32
    return %c0_i32, %c0_i32_0, %c0_i32_1 : i32, i32, i32
  }
  func.func @transform_12(%arg0: i32) -> (i32, i32) {
    %c0_i32 = arith.constant 0 : i32
    %c0_i32_0 = arith.constant 0 : i32
    %c0_i32_1 = arith.constant 0 : i32
    return %c0_i32, %c0_i32_0 : i32, i32
  }
  func.func @transform_13(%arg0: i32) -> (i32, i32) {
    %c0_i32 = arith.constant 0 : i32
    %c0_i32_0 = arith.constant 0 : i32
    %c0_i32_1 = arith.constant 0 : i32
    return %c0_i32, %c0_i32_0 : i32, i32
  }
  func.func @transform_14(%arg0: i32) -> (i32, i32) {
    %c0_i32 = arith.constant 0 : i32
    %c0_i32_0 = arith.constant 0 : i32
    %c0_i32_1 = arith.constant 0 : i32
    return %c0_i32, %c0_i32_0 : i32, i32
  }
  func.func @transform_15(%arg0: i32) -> (i32, i32) {
    %c0_i32 = arith.constant 0 : i32
    %c0_i32_0 = arith.constant 0 : i32
    %c0_i32_1 = arith.constant 0 : i32
    return %c0_i32, %c0_i32_0 : i32, i32
  }
  func.func @transform_16(%arg0: i32) -> (i32, i32) {
    %c0_i32 = arith.constant 0 : i32
    %c0_i32_0 = arith.constant 0 : i32
    %c0_i32_1 = arith.constant 0 : i32
    return %c0_i32, %c0_i32_0 : i32, i32
  }
}

</mosaic_0001>

<bundles_post_ra>
// kernel: _up_apply.1
= control target key start
LH: loop header
LB: loop body
LE: loop exit
PB: predicated region body
PF: predicated region fallthrough
CT: control target
= control target key end

     0   :  { %vm63_vm0 = vcmask 261120   ;;  %vm145_vm1 = vcmask 130048   ;;  %vm263_vm2 = vcmask 523264   ;;  %vm1392_vm3 = vcmask 1043456   ;;  %s4346_s3 = inlined_call_operand.vmem [shape: f32[32,64], index: 3, kind: input, shape index: {}]   ;;  %s4347_s0 = inlined_call_operand.vmem [shape: f32[16,32], index: 0, kind: input, shape index: {}]   ;;  %s4348_s2 = inlined_call_operand.vmem [shape: f32[32,16], index: 2, kind: input, shape index: {}]   ;;  %s4349_s6 = inlined_call_operand.vmem [shape: f32[3,64,64], index: 6, kind: input, shape index: {}]   ;;  %s4350_s5 = inlined_call_operand.vmem [shape: f32[3,64,64], index: 5, kind: input, shape index: {}]   ;;  %s4351_s1 = inlined_call_operand.vmem [shape: f32[32,64], index: 1, kind: input, shape index: {}]   ;;  %s4352_s4 = inlined_call_operand.vmem [shape: f32[3,32,32], index: 4, kind: input, shape index: {}]   ;;  %s4353_s9 = inlined_call_operand.vmem [shape: f32[64,4], index: 9, kind: input, shape index: {}, may-alias: {9,14}]   ;;  %s4354_s10 = inlined_call_operand.vmem [shape: f32[4,64], index: 10, kind: input, shape index: {}, may-alias: {10,15}]   ;;  %s4355_s11 = inlined_call_operand.vmem [shape: f32[3,64,64], index: 11, kind: input, shape index: {}]   ;;  %s4356_s7 = inlined_call_operand.vmem [shape: f32[1,4], index: 7, kind: input, shape index: {}]   ;;  %s4357_s8 = inlined_call_operand.vmem [shape: f32[1,4], index: 8, kind: input, shape index: {}]   ;;  %s4358_s14 = inlined_call_operand.vmem [shape: f32[64,4], index: 14, kind: input, shape index: {}, may-alias: {9,14}]   ;;  %s4359_s15 = inlined_call_operand.vmem [shape: f32[4,64], index: 15, kind: input, shape index: {}, may-alias: {10,15}]   ;;  %s4360_s12 = inlined_call_operand.vmem [shape: f32[1,4], index: 12, kind: input, shape index: {}]   ;;  %s4361_s13 = inlined_call_operand.vmem [shape: f32[1,4], index: 13, kind: input, shape index: {}]   ;;  %s4362_s16 = inlined_call_operand.vmem [shape: f32[32,64], index: 16, kind: output, shape index: {}]  }
   0x1   :  { %4364 = sst [smem:[#allocation2_spill]] %s4346_s3  ;;  %v57_v5 = vld [vmem:[%s4347_s0] sm:$0xff]  ;;  %v58_v7 = vld [vmem:[%s4347_s0 + $0x8] sm:$0xff]  ;;  %v2557_v12 = vld [vmem:[%s4349_s6 + $0x50] sm:$0xff]  ;;  %vm3617_vm4 = vmmov 0   ;;  %vm1349_vm5 = vcmask 31744  }
   0x2   :  { %s4365_s23 = sld [smem:[#allocation2_spill]]  ;;  %2911 = vmatprep.mubr.msk.f32.mxu0 %vm63_vm0, %v57_v5  ;;  %v53_v8 = vld [vmem:[%s4348_s2] sm:$0xff]  ;;  %v2556_v10 = vld [vmem:[%s4349_s6 + $0x48] sm:$0xff]  ;;  %v2558_v13 = vld [vmem:[%s4349_s6 + $0x58] sm:$0xff] }
   0x3   :  { %2918 = vmatprep.mubr.msk.f32.mxu1 %vm145_vm1, %v53_v8  ;;  %v2555_v9 = vld [vmem:[%s4349_s6 + $0x40] sm:$0xff]  ;;  %v3362_v14 = vpack.c.bf16 %v2558_v13, %v2557_v12  ;;  %v2560_v16 = vld [vmem:[%s4349_s6 + $0x68] sm:$0xff]  ;;  %v2561_v18 = vld [vmem:[%s4349_s6 + $0x70] sm:$0xff] }
   0x4   :  { %v3358_v11 = vpack.c.bf16 %v2556_v10, %v2555_v9  ;;  %v2559_v15 = vld [vmem:[%s4349_s6 + $0x60] sm:$0xff]  ;;  %v2562_v19 = vld [vmem:[%s4349_s6 + $0x78] sm:$0xff]  ;;  %v256_v22 = vld [vmem:[%s4349_s6 + $0x8] sm:$0xff] }
   0x5   :  { %v3366_v17 = vpack.c.bf16 %v2560_v16, %v2559_v15  ;;  %v3370_v20 = vpack.c.bf16 %v2562_v19, %v2561_v18  ;;  %v255_v21 = vld [vmem:[%s4349_s6] sm:$0xff]  ;;  %v257_v27 = vld [vmem:[%s4349_s6 + $0x10] sm:$0xff]  ;;  %v258_v28 = vld [vmem:[%s4349_s6 + $0x18] sm:$0xff] }
   0x6   :  { %v3326_v26 = vpack.c.bf16 %v256_v22, %v255_v21  ;;  %v54_v29 = vld [vmem:[%s4348_s2 + $0x8] sm:$0xff]  ;;  %v55_v30 = vld [vmem:[%s4348_s2 + $0x10] sm:$0xff]  ;;  %v3330_v31 = vpack.c.bf16 %v258_v28, %v257_v27  ;;  %v259_v32 = vld [vmem:[%s4349_s6 + $0x20] sm:$0xff] }
   0x7   :  { %v260_v33 = vld [vmem:[%s4349_s6 + $0x28] sm:$0xff]  ;;  %v56_v34 = vld [vmem:[%s4348_s2 + $0x18] sm:$0xff]  ;;  %v261_v36 = vld [vmem:[%s4349_s6 + $0x30] sm:$0xff] }
   0x8   :  { %v59_v0 = vld [vmem:[%s4365_s23] sm:$0xff]  ;;  %v60_v1 = vld [vmem:[%s4365_s23 + $0x8] sm:$0xff]  ;;  %v61_v2 = vld [vmem:[%s4365_s23 + $0x10] sm:$0xff]  ;;  %v3334_v35 = vpack.c.bf16 %v260_v33, %v259_v32 }
   0x9   :  { %v3314_v3 = vpack.c.bf16 %v60_v1, %v59_v0  ;;  %v62_v4 = vld [vmem:[%s4365_s23 + $0x18] sm:$0xff]  ;;  %v247_v39 = vld [vmem:[%s4350_s5] sm:$0xff]  ;;  %v248_v40 = vld [vmem:[%s4350_s5 + $0x8] sm:$0xff] }
   0xa   :  { %v3318_v6 = vpack.c.bf16 %v62_v4, %v61_v2  ;;  %v262_v37 = vld [vmem:[%s4349_s6 + $0x38] sm:$0xff]  ;;  %v2547_v41 = vld [vmem:[%s4350_s5 + $0x40] sm:$0xff]  ;;  %v3342_v42 = vpack.c.bf16 %v248_v40, %v247_v39  ;;  %v2548_v43 = vld [vmem:[%s4350_s5 + $0x48] sm:$0xff] }
   0xb   :  { %3315 = vmatprep.subr.bf16.mxu0 %v3314_v3  ;;  %v3338_v38 = vpack.c.bf16 %v262_v37, %v261_v36  ;;  %v3374_v44 = vpack.c.bf16 %v2548_v43, %v2547_v41  ;;  %v249_v45 = vld [vmem:[%s4350_s5 + $0x10] sm:$0xff]  ;;  %v250_v46 = vld [vmem:[%s4350_s5 + $0x18] sm:$0xff]  ;;  %v251_v53 = vld [vmem:[%s4350_s5 + $0x20] sm:$0xff] }
   0xc   :  { %3317 = vmatpush3.bf16.msra.mxu0 %v3314_v3  ;;  %v2549_v47 = vld [vmem:[%s4350_s5 + $0x50] sm:$0xff]  ;;  %v2550_v48 = vld [vmem:[%s4350_s5 + $0x58] sm:$0xff]  ;;  %v3346_v51 = vpack.c.bf16 %v250_v46, %v249_v45  ;;  %v252_v54 = vld [vmem:[%s4350_s5 + $0x28] sm:$0xff] }
   0xd   :  { %3319 = vmatprep.subr.bf16.mxu0 %v3318_v6  ;;  %v3378_v52 = vpack.c.bf16 %v2550_v48, %v2549_v47  ;;  %v2551_v55 = vld [vmem:[%s4350_s5 + $0x60] sm:$0xff]  ;;  %v2552_v56 = vld [vmem:[%s4350_s5 + $0x68] sm:$0xff]  ;;  %v3350_v58 = vpack.c.bf16 %v252_v54, %v251_v53  ;;  %v253_v61 = vld [vmem:[%s4350_s5 + $0x30] sm:$0xff] }
   0xe   :  { %v3382_v59 = vpack.c.bf16 %v2552_v56, %v2551_v55  ;;  %v254_v62 = vld [vmem:[%s4350_s5 + $0x38] sm:$0xff]  ;;  %v2553_v63 = vld [vmem:[%s4350_s5 + $0x70] sm:$0xff]  ;;  %v3862_v1 = vld [vmem:[%s4351_s1] sm:$0xff] }
   0xf   :  { %v2554_v0 = vld [vmem:[%s4350_s5 + $0x78] sm:$0xff]  ;;  %v3354_v2 = vpack.c.bf16 %v254_v62, %v253_v61  ;;  %v2591_v4 = vld [vmem:[%s4349_s6 + $0x80] sm:$0xff]  ;;  %v2592_v5 = vld [vmem:[%s4349_s6 + $0x88] sm:$0xff] }
  0x10   :  { %3321 = vmatpush3.bf16.msra.mxu0 %v3318_v6  ;;  %v3386_v3 = vpack.c.bf16 %v2554_v0, %v2553_v63  ;;  %v3406_v6 = vpack.c.bf16 %v2592_v5, %v2591_v4  ;;  %v2594_v8 = vld [vmem:[%s4349_s6 + $0x98] sm:$0xff]  ;;  %v244_v9 = vld [vmem:[%s4351_s1 + $0x8] sm:$0xff]  ;;  %v245_v10 = vld [vmem:[%s4351_s1 + $0x10] sm:$0xff] }
  0x11   :  { %3359 = vmatprep.subr.bf16.mxu0 %v3358_v11  ;;  %v2595_v12 = vld [vmem:[%s4349_s6 + $0xa0] sm:$0xff]  ;;  %v2596_v13 = vld [vmem:[%s4349_s6 + $0xa8] sm:$0xff]  ;;  %v2597_v16 = vld [vmem:[%s4349_s6 + $0xb0] sm:$0xff] }
  0x12   :  { %v3414_v15 = vpack.c.bf16 %v2596_v13, %v2595_v12  ;;  %v2583_v19 = vld [vmem:[%s4350_s5 + $0x80] sm:$0xff]  ;;  %v2585_v22 = vld [vmem:[%s4350_s5 + $0x90] sm:$0xff]  ;;  %v1144_v33 = vld [vmem:[%s4353_s9 + $0x8] sm:$0xff] }
  0x13   :  { %2912 = vmatmul.mubr.msk.f32.vlgmr.msra.gmra.mrb[0].mxu0 %vm63_vm0, %v58_v7  ;;  %v2593_v7 = vld [vmem:[%s4349_s6 + $0x90] sm:$0xff]  ;;  %v1143_v32 = vld [vmem:[%s4353_s9] sm:$0xff]  ;;  %v1146_v36 = vld [vmem:[%s4353_s9 + $0x18] sm:$0xff] }
  0x14   :  { %3361 = vmatpush3.bf16.msra.mxu0 %v3358_v11  ;;  %v3410_v11 = vpack.c.bf16 %v2594_v8, %v2593_v7  ;;  %v2589_v28 = vld [vmem:[%s4350_s5 + $0xb0] sm:$0xff]  ;;  %v1148_v39 = vld [vmem:[%s4353_s9 + $0x28] sm:$0xff]  ;;  %v4032_v62 = vld [vmem:[%s4352_s4 + $0x18] sm:$0xff] }
  0x15   :  { %3363 = vmatprep.subr.bf16.mxu0 %v3362_v14  ;;  %v1149_v41 = vld [vmem:[%s4353_s9 + $0x30] sm:$0xff]  ;;  %v3990_v56 = vld [vmem:[%s4352_s4 + $0x28] sm:$0xff]  ;;  %v4037_v63 = vld [vmem:[%s4352_s4 + $0x40] sm:$0xff] }
  0x16   :  { %v4023_v61 = vld [vmem:[%s4352_s4 + $0x10] sm:$0xff]  ;;  %v4061_v8 = vld [vmem:[%s4352_s4 + $0x58] sm:$0xff] }
  0x17   :  { %v4051_v7 = vld [vmem:[%s4352_s4 + $0x50] sm:$0xff] }
  0x18   :  { %3365 = vmatpush3.bf16.msra.mxu0 %v3362_v14  ;;  %v246_v14 = vld [vmem:[%s4351_s1 + $0x18] sm:$0xff] }
  0x19   :  { %3367 = vmatprep.subr.bf16.mxu0 %v3366_v17 }
  0x1c   :  { %3369 = vmatpush3.bf16.msra.mxu0 %v3366_v17  ;;  %v2598_v17 = vld [vmem:[%s4349_s6 + $0xb8] sm:$0xff] }
  0x1d   :  { %3371 = vmatprep.subr.bf16.mxu0 %v3370_v20  ;;  %v3418_v18 = vpack.c.bf16 %v2598_v17, %v2597_v16  ;;  %v3616_v17 = vmov 0.0  }
  0x20   :  { %3373 = vmatpush3.bf16.msra.mxu0 %v3370_v20  ;;  %v2584_v20 = vld [vmem:[%s4350_s5 + $0x88] sm:$0xff] }
  0x21   :  { %3375 = vmatprep.subr.bf16.mxu0 %v3374_v44  ;;  %v3422_v21 = vpack.c.bf16 %v2584_v20, %v2583_v19  ;;  %v1559_v19 = vld [vmem:[%s4355_s11] sm:$0xff]  ;;  %v1560_v20 = vld [vmem:[%s4355_s11 + $0x8] sm:$0xff] }
  0xe6   :  { %v2913_v23 = vpop.f32.mrb[0].mxu0 }
  0xe7   :  { %v136_v24 = vpop.f32.mrb[1].mxu0 }
  0xe8   :  { %v3322_v25 = vpack.c.bf16 %v2913_v23, %v136_v24  ;;  %v2586_v23 = vld [vmem:[%s4350_s5 + $0x98] sm:$0xff] }
  0xe9   :  { %v3426_v24 = vpack.c.bf16 %v2586_v23, %v2585_v22 }
  0xea   :  { %3323 = vmatprep.subr.bf16.mxu1 %v3322_v25 }
  0xeb   :  { %3325 = vmatpush3.bf16.msra.mxu1 %v3322_v25  ;;  %v2587_v25 = vld [vmem:[%s4350_s5 + $0xa0] sm:$0xff] }
  0xec   :  { %3327 = vmatprep.subr.bf16.mxu1 %v3326_v26 }
  0xee   :  { %2919 = vmatmul.mubr.msk.f32.vlgmr.msra.gmra.mrb[0].mxu1 %vm145_vm1, %v54_v29  ;;  %v2590_v29 = vld [vmem:[%s4350_s5 + $0xb8] sm:$0xff] }
  0xef   :  { %2921 = vmatprep.mubr.msk.f32.mxu1 %vm145_vm1, %v55_v30  ;;  %3329 = vmatpush3.bf16.msra.mxu1 %v3326_v26  ;;  %v2588_v26 = vld [vmem:[%s4350_s5 + $0xa8] sm:$0xff]  ;;  %v3434_v30 = vpack.c.bf16 %v2590_v29, %v2589_v28 }
  0xf0   :  { %3331 = vmatprep.subr.bf16.mxu1 %v3330_v31  ;;  %v3430_v27 = vpack.c.bf16 %v2588_v26, %v2587_v25 }
  0xf2   :  { %2922 = vmatmul.mubr.msk.f32.gmra.mrb[2].mxu1 %vm145_vm1, %v56_v34  ;;  %v1145_v34 = vld [vmem:[%s4353_s9 + $0x10] sm:$0xff] }
  0xf3   :  { %3333 = vmatpush3.bf16.msra.mxu1 %v3330_v31  ;;  %v3947_v31 = vld [vmem:[%s4352_s4 + $0x20] sm:$0xff]  ;;  %v3966_v37 = vpack.c.bf16 %v1146_v36, %v1145_v34 }
  0xf4   :  { %3335 = vmatprep.subr.bf16.mxu1 %v3334_v35 }
  0xf7   :  { %3337 = vmatpush3.bf16.msra.mxu1 %v3334_v35  ;;  %v3960_v35 = vpack.c.bf16 %v1144_v33, %v1143_v32 }
  0xf8   :  { %3339 = vmatprep.subr.bf16.mxu1 %v3338_v38 }
  0xfb   :  { %3341 = vmatpush3.bf16.msra.mxu1 %v3338_v38  ;;  %v1147_v38 = vld [vmem:[%s4353_s9 + $0x20] sm:$0xff] }
  0xfc   :  { %3343 = vmatprep.subr.bf16.mxu1 %v3342_v42  ;;  %v3976_v40 = vpack.c.bf16 %v1148_v39, %v1147_v38 }
 0x1c1   :  { %v3811_v49 = vpop.f32.mrb[0].mxu1 }
 0x1c2   :  { %v3813_v50 = vpop.f32.mrb[1].mxu1 }
 0x1c3   :  { %2940 = vmatprep.mubr.msk.f32.mxu1 %vm263_vm2, %v3813_v50  ;;  %2984 = vmatprep.mubr.msk.f32.mxu0 %vm263_vm2, %v3813_v50 }
 0x1c4   :  { %2941 = vmatmul.mubr.msk.f32.vlgmr.msra.gmra.mrb[4].mxu1 %vm263_vm2, %v3811_v49  ;;  %2985 = vmatmul.mubr.msk.f32.vlgmr.msra.gmra.mrb[2].mxu0 %vm263_vm2, %v3811_v49 }
 0x1c5   :  { %3345 = vmatpush3.bf16.msra.mxu1 %v3342_v42  ;;  %3377 = vmatpush3.bf16.msra.mxu0 %v3374_v44  ;;  %v3835_v57 = vpop.f32.mrb[2].mxu1  ;;  %v1150_v42 = vld [vmem:[%s4353_s9 + $0x38] sm:$0xff] }
 0x1c6   :  { %3347 = vmatprep.subr.bf16.mxu1 %v3346_v51  ;;  %3379 = vmatprep.subr.bf16.mxu0 %v3378_v52  ;;  %v3837_v60 = vpop.f32.mrb[3].mxu1  ;;  %v3458_v43 = vpack.c.bf16 %v1150_v42, %v1149_v41 }
 0x1c7   :  { %2943 = vmatprep.mubr.msk.f32.mxu1 %vm263_vm2, %v3837_v60  ;;  %2987 = vmatprep.mubr.msk.f32.mxu0 %vm263_vm2, %v3837_v60 }
 0x1c8   :  { %2944 = vmatmul.mubr.msk.f32.gmra.mrb[6].mxu1 %vm263_vm2, %v3835_v57  ;;  %2988 = vmatmul.mubr.msk.f32.gmra.mrb[4].mxu0 %vm263_vm2, %v3835_v57 }
 0x1c9   :  { %3349 = vmatpush3.bf16.msra.mxu1 %v3346_v51  ;;  %3381 = vmatpush3.bf16.msra.mxu0 %v3378_v52 }
 0x1ca   :  { %3351 = vmatprep.subr.bf16.mxu1 %v3350_v58  ;;  %3383 = vmatprep.subr.bf16.mxu0 %v3382_v59 }
 0x1cb   :  { %2962 = vmatprep.mubr.msk.f32.mxu1 %vm263_vm2, %v3862_v1  ;;  %3006 = vmatprep.mubr.msk.f32.mxu0 %vm263_vm2, %v3862_v1 }
 0x1cd   :  { %3353 = vmatpush3.bf16.msra.mxu1 %v3350_v58  ;;  %3385 = vmatpush3.bf16.msra.mxu0 %v3382_v59  ;;  %v4004_v58 = vld [vmem:[%s4352_s4 + $0x38] sm:$0xff]  ;;  %v4009_v59 = vld [vmem:[%s4352_s4] sm:$0xff] }
 0x1ce   :  { %3355 = vmatprep.subr.bf16.mxu1 %v3354_v2  ;;  %3387 = vmatprep.subr.bf16.mxu0 %v3386_v3 }
 0x1d1   :  { %3357 = vmatpush3.bf16.msra.mxu1 %v3354_v2  ;;  %3389 = vmatpush3.bf16.msra.mxu0 %v3386_v3 }
 0x1d2   :  { %3407 = vmatprep.subr.bf16.mxu0 %v3406_v6 }
 0x1d4   :  { %2963 = vmatmul.mubr.msk.f32.vlgmr.msra.gmra.mrb[4].mxu1 %vm263_vm2, %v244_v9  ;;  %3007 = vmatmul.mubr.msk.f32.vlgmr.msra.gmra.mrb[2].mxu0 %vm263_vm2, %v244_v9 }
 0x1d5   :  { %3409 = vmatpush3.bf16.msra.mxu0 %v3406_v6  ;;  %2965 = vmatprep.mubr.msk.f32.mxu1 %vm263_vm2, %v245_v10  ;;  %v4046_v6 = vld [vmem:[%s4352_s4 + $0x48] sm:$0xff] }
 0x1d6   :  { %3009 = vmatprep.mubr.msk.f32.mxu0 %vm263_vm2, %v245_v10  ;;  %3411 = vmatprep.subr.bf16.mxu0 %v3410_v11 }
 0x1d8   :  { %2966 = vmatmul.mubr.msk.f32.gmra.mrb[6].mxu1 %vm263_vm2, %v246_v14  ;;  %3010 = vmatmul.mubr.msk.f32.gmra.mrb[4].mxu0 %vm263_vm2, %v246_v14 }
 0x1d9   :  { %3413 = vmatpush3.bf16.msra.mxu0 %v3410_v11  ;;  %3056 = vmatprep.mubr.msk.f32.mxu0 %vm263_vm2, %v3813_v50 }
 0x1da   :  { %3415 = vmatprep.subr.bf16.mxu0 %v3414_v15  ;;  %3020 = vmatprep.mubr.msk.f32.mxu1 %vm63_vm0, %v3947_v31 }
 0x1dd   :  { %3417 = vmatpush3.bf16.msra.mxu0 %v3414_v15 }
 0x1de   :  { %3419 = vmatprep.subr.bf16.mxu0 %v3418_v18 }
 0x1e1   :  { %3421 = vmatpush3.bf16.msra.mxu0 %v3418_v18  ;;  %v4102_v18 = vld [vmem:[%s4354_s10] sm:$0xf] }
 0x1e2   :  { %3423 = vmatprep.subr.bf16.mxu0 %v3422_v21 }
 0x1e4   :  { %3057 = vmatmul.mubr.msk.f32.vlgmr.msra.gmra.mrb[6].mxu0 %vm263_vm2, %v3811_v49 }
 0x1e5   :  { %3059 = vmatprep.mubr.msk.f32.mxu0 %vm263_vm2, %v3837_v60  ;;  %3425 = vmatpush3.bf16.msra.mxu0 %v3422_v21  ;;  %v4018_v60 = vld [vmem:[%s4352_s4 + $0x8] sm:$0xff]  ;;  %v3478_v21 = vpack.c.bf16 %v1560_v20, %v1559_v19 }
 0x1e6   :  { %3427 = vmatprep.subr.bf16.mxu0 %v3426_v24 }
 0x1e8   :  { %3060 = vmatmul.mubr.msk.f32.gmra.mrb[8].mxu0 %vm263_vm2, %v3835_v57  ;;  %v3995_v57 = vld [vmem:[%s4352_s4 + $0x30] sm:$0xff] }
 0x1e9   :  { %3429 = vmatpush3.bf16.msra.mxu0 %v3426_v24  ;;  %3078 = vmatprep.mubr.msk.f32.mxu0 %vm263_vm2, %v3862_v1 }
 0x1ea   :  { %3431 = vmatprep.subr.bf16.mxu0 %v3430_v27 }
 0x1ed   :  { %3433 = vmatpush3.bf16.msra.mxu0 %v3430_v27 }
 0x1ee   :  { %3435 = vmatprep.subr.bf16.mxu0 %v3434_v30 }
 0x1f1   :  { %3437 = vmatpush3.bf16.msra.mxu0 %v3434_v30 }
 0x1f2   :  { %3463 = vmatprep.subr.bf16.mxu0 %v3960_v35 }
 0x1f4   :  { %3079 = vmatmul.mubr.msk.f32.vlgmr.msra.gmra.mrb[6].mxu0 %vm263_vm2, %v244_v9 }
 0x1f5   :  { %3081 = vmatprep.mubr.msk.f32.mxu0 %vm263_vm2, %v245_v10  ;;  %3465 = vmatpush3.bf16.msra.mxu0 %v3960_v35 }
 0x1f6   :  { %3467 = vmatprep.subr.bf16.mxu0 %v3966_v37 }
 0x1f8   :  { %3082 = vmatmul.mubr.msk.f32.gmra.mrb[8].mxu0 %vm263_vm2, %v246_v14 }
 0x1f9   :  { %3469 = vmatpush3.bf16.msra.mxu0 %v3966_v37 }
 0x1fa   :  { %3471 = vmatprep.subr.bf16.mxu0 %v3976_v40 }
 0x1fd   :  { %3473 = vmatpush3.bf16.msra.mxu0 %v3976_v40 }
 0x1fe   :  { %3475 = vmatprep.subr.bf16.mxu0 %v3458_v43 }
 0x201   :  { %3477 = vmatpush3.bf16.msra.mxu0 %v3458_v43 }
 0x202   :  { %3479 = vmatprep.subr.bf16.mxu0 %v3478_v21 }
 0x2a7   :  { %v2964_v44 = vpop.f32.mrb[4].mxu1  ;;  %v3008_v45 = vpop.f32.mrb[2].mxu0 }
 0x2a8   :  { %v439_v46 = vpop.f32.mrb[5].mxu1  ;;  %v631_v47 = vpop.f32.mrb[3].mxu0 }
 0x2a9   :  { %v3398_v48 = vpack.c.bf16 %v2964_v44, %v439_v46  ;;  %v3390_v49 = vpack.c.bf16 %v3008_v45, %v631_v47 }
 0x2ab   :  { %v2967_v50 = vpop.f32.mrb[6].mxu1  ;;  %v3011_v51 = vpop.f32.mrb[4].mxu0  ;;  %3391 = vmatprep.subr.bf16.mxu1 %v3390_v49 }
 0x2ac   :  { %v449_v52 = vpop.f32.mrb[7].mxu1  ;;  %v641_v53 = vpop.f32.mrb[5].mxu0  ;;  %3393 = vmatpush3.bf16.msra.mxu1 %v3390_v49 }
 0x2ad   :  { %v3402_v54 = vpack.c.bf16 %v2967_v50, %v449_v52  ;;  %v3394_v55 = vpack.c.bf16 %v3011_v51, %v641_v53 }
 0x2af   :  { %3395 = vmatprep.subr.bf16.mxu1 %v3394_v55 }
 0x2b0   :  { %3397 = vmatpush3.bf16.msra.mxu1 %v3394_v55 }
 0x2b1   :  { %3399 = vmatprep.subr.bf16.mxu1 %v3398_v48 }
 0x2b3   :  { %3021 = vmatmul.mubr.msk.f32.vlgmr.msra.gmra.mrb[8].mxu1 %vm63_vm0, %v3990_v56 }
 0x2b4   :  { %3401 = vmatpush3.bf16.msra.mxu1 %v3398_v48  ;;  %3023 = vmatprep.mubr.msk.f32.mxu1 %vm63_vm0, %v3995_v57 }
 0x2b5   :  { %3403 = vmatprep.subr.bf16.mxu1 %v3402_v54 }
 0x2b7   :  { %3024 = vmatmul.mubr.msk.f32.gmra.mrb[10].mxu1 %vm63_vm0, %v4004_v58 }
 0x2b8   :  { %3405 = vmatpush3.bf16.msra.mxu1 %v3402_v54  ;;  %3034 = vmatprep.mubr.msk.f32.mxu1 %vm63_vm0, %v4009_v59 }
 0x2bb   :  { %3035 = vmatmul.mubr.msk.f32.vlgmr.msra.gmra.mrb[8].mxu1 %vm63_vm0, %v4018_v60 }
 0x2bc   :  { %3037 = vmatprep.mubr.msk.f32.mxu1 %vm63_vm0, %v4023_v61 }
 0x2bf   :  { %3038 = vmatmul.mubr.msk.f32.gmra.mrb[10].mxu1 %vm63_vm0, %v4032_v62 }
 0x2c0   :  { %3092 = vmatprep.mubr.msk.f32.mxu1 %vm63_vm0, %v4037_v63 }
 0x2c7   :  { %v3080_v0 = vpop.f32.mrb[6].mxu0 }
 0x2c8   :  { %v1018_v1 = vpop.f32.mrb[7].mxu0 }
 0x2c9   :  { %v3438_v2 = vpack.c.bf16 %v3080_v0, %v1018_v1 }
 0x2cb   :  { %v3083_v3 = vpop.f32.mrb[8].mxu0  ;;  %3439 = vmatprep.subr.bf16.mxu1 %v3438_v2 }
 0x2cc   :  { %v1028_v4 = vpop.f32.mrb[9].mxu0  ;;  %3441 = vmatpush3.bf16.msra.mxu1 %v3438_v2 }
 0x2cd   :  { %v3442_v5 = vpack.c.bf16 %v3083_v3, %v1028_v4 }
 0x2cf   :  { %3443 = vmatprep.subr.bf16.mxu1 %v3442_v5 }
 0x2d0   :  { %3445 = vmatpush3.bf16.msra.mxu1 %v3442_v5 }
 0x2d1   :  { %3447 = vmatprep.subr.bf16.mxu1 %v3960_v35 }
 0x2d3   :  { %3093 = vmatmul.mubr.msk.f32.vlgmr.msra.gmra.mrb[8].mxu1 %vm63_vm0, %v4046_v6 }
 0x2d4   :  { %3095 = vmatprep.mubr.msk.f32.mxu1 %vm63_vm0, %v4051_v7  ;;  %3449 = vmatpush3.bf16.msra.mxu1 %v3960_v35 }
 0x2d5   :  { %3451 = vmatprep.subr.bf16.mxu1 %v3966_v37 }
 0x2d7   :  { %3096 = vmatmul.mubr.msk.f32.gmra.mrb[10].mxu1 %vm63_vm0, %v4061_v8 }
 0x2d8   :  { %3453 = vmatpush3.bf16.msra.mxu1 %v3966_v37 }
 0x2d9   :  { %3455 = vmatprep.subr.bf16.mxu1 %v3976_v40 }
 0x2dc   :  { %3457 = vmatpush3.bf16.msra.mxu1 %v3976_v40 }
 0x2dd   :  { %3459 = vmatprep.subr.bf16.mxu1 %v3458_v43 }
 0x2e0   :  { %3461 = vmatpush3.bf16.msra.mxu1 %v3458_v43 }
 0x2e1   :  { %3142 = vmatprep.subr.mxu1 %v3616_v17 }
 0x3a6   :  { %v4070_v9 = vpop.f32.mrb[8].mxu1 }
 0x3a7   :  { %v4072_v10 = vpop.f32.mrb[9].mxu1  ;;  %v1249_v12 = vmul.f32 %v4070_v9, %v4070_v9 }
 0x3a8   :  { %v1248_v11 = vmul.f32 %v4072_v10, %v4072_v10  ;;  %3114 = vmatprep.mubr.msk.f32.mxu1 %vm263_vm2, %v4072_v10 }
 0x3a9   :  { %3115 = vmatmul.mubr.msk.f32.vlgmr.msra.gmra.mrb[12].mxu1 %vm263_vm2, %v4070_v9 }
 0x3aa   :  { %v4082_v13 = vpop.f32.mrb[10].mxu1  ;;  %3136 = vmatprep.mubr.msk.f32.mxu0 %vm263_vm2, %v1248_v11  ;;  %3143 = vmatpush3.msk.msra.mxu1 %vm1392_vm3, %v4102_v18 }
 0x3ab   :  { %v4085_v14 = vpop.f32.mrb[11].mxu1  ;;  %3137 = vmatmul.mubr.msk.f32.vlgmr.msra.gmra.mrb[10].mxu0 %vm263_vm2, %v1249_v12  ;;  %v1251_v16 = vmul.f32 %v4082_v13, %v4082_v13  ;;  %3147 = vmatprep.subr.mxu1 %v3616_v17  ;;  %v1383_v12 = vld [vmem:[%s4356_s7] sm:$0x1] }
 0x3ac   :  { %v1250_v15 = vmul.f32 %v4085_v14, %v4085_v14  ;;  %3117 = vmatprep.mubr.msk.f32.mxu1 %vm263_vm2, %v4085_v14  ;;  %3481 = vmatpush3.bf16.msra.mxu0 %v3478_v21 }
 0x3ad   :  { %3118 = vmatmul.mubr.msk.f32.gmra.mrb[14].mxu1 %vm263_vm2, %v4082_v13 }
 0x3ae   :  { %3139 = vmatprep.mubr.msk.f32.mxu0 %vm263_vm2, %v1250_v15  ;;  %3144 = vmatprep.mubr.msk.f32.mxu1 %vm3617_vm4, %v3616_v17  ;;  %v2631_v15 = vld [vmem:[%s4355_s11 + $0x40] sm:$0xff] }
 0x3af   :  { %3140 = vmatmul.mubr.msk.f32.gmra.mrb[12].mxu0 %vm263_vm2, %v1251_v16  ;;  %v2632_v16 = vld [vmem:[%s4355_s11 + $0x48] sm:$0xff] }
 0x3b0   :  { %v3494_v21 = vpack.c.bf16 %v2632_v16, %v2631_v15  ;;  %v2655_v16 = vld [vmem:[%s4355_s11 + $0xa0] sm:$0xff] }
 0x47c   :  { %v3116_v22 = vpop.f32.mrb[12].mxu1 }
 0x47d   :  { %v1351_v23 = vsel %vm1349_vm5, %v3116_v22, 0.0  ;;  %v1229_v24 = vpop.f32.mrb[13].mxu1  ;;  %v1385_v22 = vld [vmem:[%s4357_s8] sm:$0x1] }
 0x47e   :  { %v1350_v25 = vsel %vm1349_vm5, %v1229_v24, 0.0  ;;  %v3138_v26 = vpop.f32.mrb[10].mxu0  ;;  %v2634_v24 = vld [vmem:[%s4355_s11 + $0x58] sm:$0xff] }
 0x47f   :  { %v1352_v27 = vadd.f32 %v1351_v23, %v1350_v25  ;;  %v1364_v28 = vsel %vm1349_vm5, %v3138_v26, 0.0  ;;  %v1330_v29 = vpop.f32.mrb[11].mxu0  ;;  %v2633_v23 = vld [vmem:[%s4355_s11 + $0x50] sm:$0xff] }
 0x480   :  { %v1363_v30 = vsel %vm1349_vm5, %v1330_v29, 0.0  ;;  %v3119_v32 = vpop.f32.mrb[14].mxu1  ;;  %v1562_v29 = vld [vmem:[%s4355_s11 + $0x18] sm:$0xff] }
 0x481   :  { %v1365_v33 = vadd.f32 %v1364_v28, %v1363_v30  ;;  %v1239_v34 = vpop.f32.mrb[15].mxu1  ;;  %v1355_v39 = vsel %vm1349_vm5, %v3119_v32, 0.0  ;;  %v1561_v28 = vld [vmem:[%s4355_s11 + $0x10] sm:$0xff]  ;;  %v2635_v30 = vld [vmem:[%s4355_s11 + $0x60] sm:$0xff]  ;;  %v2636_v32 = vld [vmem:[%s4355_s11 + $0x68] sm:$0xff] }
 0x482   :  { %v1353_v35 = vsel %vm1349_vm5, %v1239_v34, 0.0  ;;  %v3141_v36 = vpop.f32.mrb[12].mxu0  ;;  %v1563_v34 = vld [vmem:[%s4355_s11 + $0x20] sm:$0xff] }
 0x483   :  { %v1354_v37 = vadd.f32 %v1353_v35, %v1352_v27  ;;  %v1340_v38 = vpop.f32.mrb[13].mxu0  ;;  %v1368_v43 = vsel %vm1349_vm5, %v3141_v36, 0.0  ;;  %v3498_v27 = vpack.c.bf16 %v2634_v24, %v2633_v23  ;;  %v1564_v35 = vld [vmem:[%s4355_s11 + $0x28] sm:$0xff]  ;;  %v2658_v23 = vld [vmem:[%s4355_s11 + $0xb8] sm:$0xff] }
 0x484   :  { %v1366_v40 = vsel %vm1349_vm5, %v1340_v38, 0.0  ;;  %v3486_v36 = vpack.c.bf16 %v1564_v35, %v1563_v34  ;;  %v2638_v38 = vld [vmem:[%s4355_s11 + $0x78] sm:$0xff] }
 0x485   :  { %v1356_v41 = vadd.f32 %v1355_v39, %v1354_v37  ;;  %v1367_v42 = vadd.f32 %v1366_v40, %v1365_v33  ;;  %v3502_v33 = vpack.c.bf16 %v2636_v32, %v2635_v30  ;;  %v2637_v37 = vld [vmem:[%s4355_s11 + $0x70] sm:$0xff]  ;;  %v2116_v30 = vld [vmem:[%s4358_s14 + $0x28] sm:$0xff]  ;;  %v2118_v34 = vld [vmem:[%s4358_s14 + $0x38] sm:$0xff] }
 0x486   :  { %v3506_v39 = vpack.c.bf16 %v2638_v38, %v2637_v37  ;;  %v1565_v40 = vld [vmem:[%s4355_s11 + $0x30] sm:$0xff] }
 0x487   :  { %v1357_v44 = vrot.slane %v1356_v41, 4  ;;  %v1369_v45 = vadd.f32 %v1368_v43, %v1367_v42  ;;  %v2651_v43 = vld [vmem:[%s4355_s11 + $0x80] sm:$0xff] }
 0x489   :  { %v1358_v46 = vadd.f32 %v1357_v44, %v1356_v41  ;;  %v1370_v47 = vrot.slane %v1369_v45, 4  ;;  %v1566_v41 = vld [vmem:[%s4355_s11 + $0x38] sm:$0xff]  ;;  %v2652_v44 = vld [vmem:[%s4355_s11 + $0x88] sm:$0xff] }
 0x48a   :  { %v3490_v42 = vpack.c.bf16 %v1566_v41, %v1565_v40 }
 0x48b   :  { %v1359_v48 = vrot.slane %v1358_v46, 2  ;;  %v1371_v49 = vadd.f32 %v1370_v47, %v1369_v45  ;;  %v3526_v45 = vpack.c.bf16 %v2652_v44, %v2651_v43 }
 0x48d   :  { %v1360_v50 = vadd.f32 %v1359_v48, %v1358_v46  ;;  %v1372_v51 = vrot.slane %v1371_v49, 2  ;;  %v1539_v46 = vlaneseq }
 0x48f   :  { %v1361_v52 = vrot.slane %v1360_v50, 1  ;;  %v1373_v53 = vadd.f32 %v1372_v51, %v1371_v49  ;;  %v1540_v47 = vshrl.u32 %v1539_v46, 7 }
 0x491   :  { %v1362_v54 = vadd.f32 %v1361_v52, %v1360_v50  ;;  %v1374_v55 = vrot.slane %v1373_v53, 1  ;;  %v4183_v48 = vsub.s32 0, %v1540_v47 }
 0x493   :  { %v1376_v0 = vmul.f32 0.001953125, %v1362_v54  ;;  %v1375_v1 = vadd.f32 %v1374_v55, %v1373_v53 }
 0x495   :  { %v1378_v2 = vmul.f32 %v1376_v0, %v1376_v0  ;;  %v1377_v3 = vmul.f32 0.001953125, %v1375_v1 }
 0x497   :  { %v1379_v4 = vsub.f32 %v1377_v3, %v1378_v2 }
 0x499   :  { %v1380_v5 = vmax.f32 %v1379_v4, 0.0 }
 0x49b   :  { %v1381_v11 = vadd.f32 1e-05, %v1380_v5 }
 0x49d   :  { %3612 = vrsqrt.f32 %v1381_v11  ;;  %v2653_v11 = vld [vmem:[%s4355_s11 + $0x90] sm:$0xff] }
 0x4a7   :  { %v3613_v19 = vpop.eup %3612 }
 0x4a8   :  { %v1384_v20 = vmul.f32 %v3613_v19, %v1383_v12  ;;  %v2656_v19 = vld [vmem:[%s4355_s11 + $0xa8] sm:$0xff] }
 0x4aa   :  { %3145 = vmatmul.mubr.msk.f32.vlgmr.msra.gmra.mrb[16].mxu1 %vm1349_vm5, %v1384_v20  ;;  %v1386_v25 = vmul.f32 %v1384_v20, %v1376_v0 }
 0x4ab   :  { %3148 = vmatpush3.msk.msra.mxu1 %vm1392_vm3, %v4102_v18  ;;  %3149 = vmatprep.mubr.msk.f32.mxu1 %vm3617_vm4, %v3616_v17  ;;  %v3482_v18 = vpack.c.bf16 %v1562_v29, %v1561_v28  ;;  %v2114_v28 = vld [vmem:[%s4358_s14 + $0x18] sm:$0xff] }
 0x4ac   :  { %v1387_v26 = vsub.f32 %v1385_v22, %v1386_v25  ;;  %3495 = vmatprep.subr.bf16.mxu1 %v3494_v21  ;;  %v2657_v22 = vld [vmem:[%s4355_s11 + $0xb0] sm:$0xff]  ;;  %v2111_v25 = vld [vmem:[%s4358_s14] sm:$0xff] }
 0x4ad   :  { %3483 = vmatprep.subr.bf16.mxu0 %v3482_v18  ;;  %v3538_v24 = vpack.c.bf16 %v2658_v23, %v2657_v22 }
 0x4ae   :  { %3150 = vmatmul.mubr.msk.f32.vlgmr.msra.gmra.mrb[18].mxu1 %vm1349_vm5, %v1387_v26  ;;  %3485 = vmatpush3.bf16.msra.mxu0 %v3482_v18  ;;  %v2112_v26 = vld [vmem:[%s4358_s14 + $0x8] sm:$0xff]  ;;  %v2115_v18 = vld [vmem:[%s4358_s14 + $0x20] sm:$0xff] }
 0x4af   :  { %3497 = vmatpush3.bf16.msra.mxu1 %v3494_v21  ;;  %3487 = vmatprep.subr.bf16.mxu0 %v3486_v36  ;;  %v3534_v21 = vpack.c.bf16 %v2656_v19, %v2655_v16  ;;  %v3558_v32 = vpack.c.bf16 %v2116_v30, %v2115_v18 }
 0x4b0   :  { %3499 = vmatprep.subr.bf16.mxu1 %v3498_v27 }
 0x4b2   :  { %3489 = vmatpush3.bf16.msra.mxu0 %v3486_v36 }
 0x4b3   :  { %3501 = vmatpush3.bf16.msra.mxu1 %v3498_v27  ;;  %3491 = vmatprep.subr.bf16.mxu0 %v3490_v42  ;;  %v3550_v27 = vpack.c.bf16 %v2112_v26, %v2111_v25 }
 0x4b4   :  { %3503 = vmatprep.subr.bf16.mxu1 %v3502_v33 }
 0x4b6   :  { %3493 = vmatpush3.bf16.msra.mxu0 %v3490_v42 }
 0x4b7   :  { %3505 = vmatpush3.bf16.msra.mxu1 %v3502_v33  ;;  %v2117_v33 = vld [vmem:[%s4358_s14 + $0x30] sm:$0xff] }
 0x4b8   :  { %3507 = vmatprep.subr.bf16.mxu1 %v3506_v39  ;;  %v3562_v35 = vpack.c.bf16 %v2118_v34, %v2117_v33 }
 0x4bb   :  { %3509 = vmatpush3.bf16.msra.mxu1 %v3506_v39 }
 0x4bc   :  { %3527 = vmatprep.subr.bf16.mxu1 %v3526_v45 }
 0x57d   :  { %v1462_v49 = vpop.f32.mrb[16].mxu1 }
 0x57e   :  { %v1542_v50 = vrot.slane %v1462_v49, %v4183_v48  ;;  %v3146_v51 = vpop.f32.mrb[17].mxu1 }
 0x580   :  { %v1543_v52 = vmul.f32 %v1542_v50, %v4072_v10  ;;  %v1544_v53 = vmul.f32 %v4070_v9, %v1542_v50  ;;  %v1545_v54 = vmul.f32 %v1542_v50, %v4085_v14  ;;  %v1546_v55 = vmul.f32 %v4082_v13, %v1542_v50  ;;  %v2654_v10 = vld [vmem:[%s4355_s11 + $0x98] sm:$0xff] }
 0x581   :  { %v1535_v0 = vpop.f32.mrb[18].mxu1  ;;  %v3530_v15 = vpack.c.bf16 %v2654_v10, %v2653_v11 }
 0x582   :  { %v1550_v1 = vrot.slane %v1535_v0, %v4183_v48  ;;  %v3151_v2 = vpop.f32.mrb[19].mxu1 }
 0x584   :  { %v1552_v3 = vadd.f32 %v1550_v1, %v1544_v53  ;;  %v1551_v4 = vadd.f32 %v1550_v1, %v1543_v52  ;;  %v1553_v5 = vadd.f32 %v1550_v1, %v1545_v54  ;;  %v1554_v9 = vadd.f32 %v1550_v1, %v1546_v55 }
 0x586   :  { %v1556_v12 = vmax.f32 %v1552_v3, 0.0  ;;  %v1555_v14 = vmax.f32 %v1551_v4, 0.0  ;;  %v1557_v13 = vmax.f32 %v1553_v5, 0.0  ;;  %v1558_v20 = vmax.f32 %v1554_v9, 0.0 }
 0x588   :  { %3168 = vmatprep.mubr.msk.f32.mxu0 %vm263_vm2, %v1555_v14  ;;  %3190 = vmatprep.mubr.msk.f32.mxu1 %vm263_vm2, %v1555_v14 }
 0x589   :  { %3169 = vmatmul.mubr.msk.f32.vlgmr.msra.gmra.mrb[14].mxu0 %vm263_vm2, %v1556_v12  ;;  %3191 = vmatmul.mubr.msk.f32.vlgmr.msra.gmra.mrb[20].mxu1 %vm263_vm2, %v1556_v12 }
 0x58a   :  { %3529 = vmatpush3.bf16.msra.mxu1 %v3526_v45  ;;  %3171 = vmatprep.mubr.msk.f32.mxu0 %vm263_vm2, %v1557_v13 }
 0x58b   :  { %3193 = vmatprep.mubr.msk.f32.mxu1 %vm263_vm2, %v1557_v13  ;;  %3531 = vmatprep.subr.bf16.mxu1 %v3530_v15 }
 0x58d   :  { %3172 = vmatmul.mubr.msk.f32.gmra.mrb[16].mxu0 %vm263_vm2, %v1558_v20  ;;  %3194 = vmatmul.mubr.msk.f32.gmra.mrb[22].mxu1 %vm263_vm2, %v1558_v20 }
 0x58e   :  { %3533 = vmatpush3.bf16.msra.mxu1 %v3530_v15  ;;  %3240 = vmatprep.mubr.msk.f32.mxu1 %vm263_vm2, %v1555_v14 }
 0x58f   :  { %3535 = vmatprep.subr.bf16.mxu1 %v3534_v21  ;;  %3204 = vmatprep.mubr.msk.f32.mxu0 %vm63_vm0, %v3947_v31  ;;  %v2113_v31 = vld [vmem:[%s4358_s14 + $0x10] sm:$0xff] }
 0x590   :  { %v3554_v29 = vpack.c.bf16 %v2114_v28, %v2113_v31 }
 0x592   :  { %3537 = vmatpush3.bf16.msra.mxu1 %v3534_v21 }
 0x593   :  { %3539 = vmatprep.subr.bf16.mxu1 %v3538_v24 }
 0x596   :  { %3541 = vmatpush3.bf16.msra.mxu1 %v3538_v24 }
 0x597   :  { %3551 = vmatprep.subr.bf16.mxu1 %v3550_v27 }
 0x599   :  { %3241 = vmatmul.mubr.msk.f32.vlgmr.msra.gmra.mrb[24].mxu1 %vm263_vm2, %v1556_v12 }
 0x59a   :  { %3243 = vmatprep.mubr.msk.f32.mxu1 %vm263_vm2, %v1557_v13  ;;  %3553 = vmatpush3.bf16.msra.mxu1 %v3550_v27 }
 0x59b   :  { %3555 = vmatprep.subr.bf16.mxu1 %v3554_v29 }
 0x59d   :  { %3244 = vmatmul.mubr.msk.f32.gmra.mrb[26].mxu1 %vm263_vm2, %v1558_v20 }
 0x59e   :  { %3557 = vmatpush3.bf16.msra.mxu1 %v3554_v29 }
 0x59f   :  { %3559 = vmatprep.subr.bf16.mxu1 %v3558_v32 }
 0x5a2   :  { %3561 = vmatpush3.bf16.msra.mxu1 %v3558_v32 }
 0x5a3   :  { %3563 = vmatprep.subr.bf16.mxu1 %v3562_v35 }
 0x5a6   :  { %3565 = vmatpush3.bf16.msra.mxu1 %v3562_v35 }
 0x5a7   :  { %3304 = vmatprep.subr.mxu1 %v3616_v17 }
 0x65c   :  { %v3170_v36 = vpop.f32.mrb[14].mxu0  ;;  %v3192_v37 = vpop.f32.mrb[20].mxu1 }
 0x65d   :  { %v1645_v38 = vpop.f32.mrb[15].mxu0  ;;  %v1739_v39 = vpop.f32.mrb[21].mxu1 }
 0x65e   :  { %v3518_v40 = vpack.c.bf16 %v3170_v36, %v1645_v38  ;;  %v3510_v41 = vpack.c.bf16 %v3192_v37, %v1739_v39 }
 0x660   :  { %v3173_v42 = vpop.f32.mrb[16].mxu0  ;;  %v3195_v43 = vpop.f32.mrb[22].mxu1  ;;  %3511 = vmatprep.subr.bf16.mxu0 %v3510_v41 }
 0x661   :  { %v1655_v44 = vpop.f32.mrb[17].mxu0  ;;  %v1749_v45 = vpop.f32.mrb[23].mxu1  ;;  %3513 = vmatpush3.bf16.msra.mxu0 %v3510_v41  ;;  %v2350_v41 = vld [vmem:[%s4360_s12] sm:$0x1] }
 0x662   :  { %v3522_v46 = vpack.c.bf16 %v3173_v42, %v1655_v44  ;;  %v3514_v47 = vpack.c.bf16 %v3195_v43, %v1749_v45  ;;  %v2352_v44 = vld [vmem:[%s4361_s13] sm:$0x1] }
 0x664   :  { %3515 = vmatprep.subr.bf16.mxu0 %v3514_v47 }
 0x665   :  { %3517 = vmatpush3.bf16.msra.mxu0 %v3514_v47 }
 0x666   :  { %3519 = vmatprep.subr.bf16.mxu0 %v3518_v40 }
 0x668   :  { %3205 = vmatmul.mubr.msk.f32.vlgmr.msra.gmra.mrb[18].mxu0 %vm63_vm0, %v3990_v56 }
 0x669   :  { %3521 = vmatpush3.bf16.msra.mxu0 %v3518_v40  ;;  %3207 = vmatprep.mubr.msk.f32.mxu0 %vm63_vm0, %v3995_v57 }
 0x66a   :  { %3523 = vmatprep.subr.bf16.mxu0 %v3522_v46 }
 0x66c   :  { %v3242_v49 = vpop.f32.mrb[24].mxu1  ;;  %3208 = vmatmul.mubr.msk.f32.gmra.mrb[20].mxu0 %vm63_vm0, %v4004_v58 }
 0x66d   :  { %v2003_v50 = vpop.f32.mrb[25].mxu1  ;;  %3525 = vmatpush3.bf16.msra.mxu0 %v3522_v46  ;;  %3218 = vmatprep.mubr.msk.f32.mxu0 %vm63_vm0, %v4009_v59 }
 0x66e   :  { %v3542_v51 = vpack.c.bf16 %v3242_v49, %v2003_v50 }
 0x670   :  { %v3245_v52 = vpop.f32.mrb[26].mxu1  ;;  %3543 = vmatprep.subr.bf16.mxu0 %v3542_v51  ;;  %3219 = vmatmul.mubr.msk.f32.vlgmr.msra.gmra.mrb[18].mxu0 %vm63_vm0, %v4018_v60 }
 0x671   :  { %v2013_v56 = vpop.f32.mrb[27].mxu1  ;;  %3545 = vmatpush3.bf16.msra.mxu0 %v3542_v51  ;;  %3221 = vmatprep.mubr.msk.f32.mxu0 %vm63_vm0, %v4023_v61 }
 0x672   :  { %v3546_v57 = vpack.c.bf16 %v3245_v52, %v2013_v56 }
 0x674   :  { %3547 = vmatprep.subr.bf16.mxu0 %v3546_v57  ;;  %3222 = vmatmul.mubr.msk.f32.gmra.mrb[20].mxu0 %vm63_vm0, %v4032_v62 }
 0x675   :  { %3549 = vmatpush3.bf16.msra.mxu0 %v3546_v57  ;;  %3254 = vmatprep.mubr.msk.f32.mxu0 %vm63_vm0, %v4037_v63 }
 0x676   :  { %3567 = vmatprep.subr.bf16.mxu0 %v3550_v27 }
 0x678   :  { %3255 = vmatmul.mubr.msk.f32.vlgmr.msra.gmra.mrb[18].mxu0 %vm63_vm0, %v4046_v6 }
 0x679   :  { %3257 = vmatprep.mubr.msk.f32.mxu0 %vm63_vm0, %v4051_v7  ;;  %3569 = vmatpush3.bf16.msra.mxu0 %v3550_v27 }
 0x67a   :  { %3571 = vmatprep.subr.bf16.mxu0 %v3554_v29 }
 0x67c   :  { %3258 = vmatmul.mubr.msk.f32.gmra.mrb[20].mxu0 %vm63_vm0, %v4061_v8  ;;  %v2355_v8 = vld [vmem:[%s4359_s15] sm:$0xf] }
 0x67d   :  { %3573 = vmatpush3.bf16.msra.mxu0 %v3554_v29 }
 0x67e   :  { %3575 = vmatprep.subr.bf16.mxu0 %v3558_v32 }
 0x681   :  { %3577 = vmatpush3.bf16.msra.mxu0 %v3558_v32 }
 0x682   :  { %3579 = vmatprep.subr.bf16.mxu0 %v3562_v35 }
 0x685   :  { %3581 = vmatpush3.bf16.msra.mxu0 %v3562_v35 }
 0x74b   :  { %v4270_v58 = vpop.f32.mrb[18].mxu0 }
 0x74c   :  { %v4272_v59 = vpop.f32.mrb[19].mxu0  ;;  %v2217_v61 = vmul.f32 %v4270_v58, %v4270_v58 }
 0x74d   :  { %v2216_v60 = vmul.f32 %v4272_v59, %v4272_v59  ;;  %3276 = vmatprep.mubr.msk.f32.mxu1 %vm263_vm2, %v4272_v59 }
 0x74e   :  { %3277 = vmatmul.mubr.msk.f32.vlgmr.msra.gmra.mrb[28].mxu1 %vm263_vm2, %v4270_v58 }
 0x74f   :  { %v4282_v62 = vpop.f32.mrb[20].mxu0  ;;  %3298 = vmatprep.mubr.msk.f32.mxu0 %vm263_vm2, %v2216_v60  ;;  %3305 = vmatpush3.msk.msra.mxu1 %vm1392_vm3, %v2355_v8 }
 0x750   :  { %v4285_v63 = vpop.f32.mrb[21].mxu0  ;;  %3299 = vmatmul.mubr.msk.f32.vlgmr.msra.gmra.mrb[22].mxu0 %vm263_vm2, %v2217_v61  ;;  %v2219_v7 = vmul.f32 %v4282_v62, %v4282_v62  ;;  %3309 = vmatprep.subr.mxu1 %v3616_v17 }
 0x751   :  { %v2218_v6 = vmul.f32 %v4285_v63, %v4285_v63  ;;  %3279 = vmatprep.mubr.msk.f32.mxu1 %vm263_vm2, %v4285_v63 }
 0x752   :  { %3280 = vmatmul.mubr.msk.f32.gmra.mrb[30].mxu1 %vm263_vm2, %v4282_v62 }
 0x753   :  { %3301 = vmatprep.mubr.msk.f32.mxu0 %vm263_vm2, %v2218_v6  ;;  %3306 = vmatprep.mubr.msk.f32.mxu1 %vm3617_vm4, %v3616_v17 }
 0x754   :  { %3302 = vmatmul.mubr.msk.f32.gmra.mrb[24].mxu0 %vm263_vm2, %v2219_v7 }
 0x821   :  { %v3278_v53 = vpop.f32.mrb[28].mxu1 }
 0x822   :  { %v2318_v54 = vsel %vm1349_vm5, %v3278_v53, 0.0  ;;  %v2197_v55 = vpop.f32.mrb[29].mxu1 }
 0x823   :  { %v2317_v0 = vsel %vm1349_vm5, %v2197_v55, 0.0  ;;  %v3300_v1 = vpop.f32.mrb[22].mxu0 }
 0x824   :  { %v2319_v2 = vadd.f32 %v2318_v54, %v2317_v0  ;;  %v2331_v3 = vsel %vm1349_vm5, %v3300_v1, 0.0  ;;  %v2298_v4 = vpop.f32.mrb[23].mxu0 }
 0x825   :  { %v2330_v5 = vsel %vm1349_vm5, %v2298_v4, 0.0  ;;  %v3281_v11 = vpop.f32.mrb[30].mxu1 }
 0x826   :  { %v2332_v10 = vadd.f32 %v2331_v3, %v2330_v5  ;;  %v2207_v9 = vpop.f32.mrb[31].mxu1  ;;  %v2322_v16 = vsel %vm1349_vm5, %v3281_v11, 0.0 }
 0x827   :  { %v2320_v12 = vsel %vm1349_vm5, %v2207_v9, 0.0  ;;  %v3303_v14 = vpop.f32.mrb[24].mxu0 }
 0x828   :  { %v2321_v15 = vadd.f32 %v2320_v12, %v2319_v2  ;;  %v2308_v13 = vpop.f32.mrb[25].mxu0  ;;  %v2335_v22 = vsel %vm1349_vm5, %v3303_v14, 0.0 }
 0x829   :  { %v2333_v19 = vsel %vm1349_vm5, %v2308_v13, 0.0 }
 0x82a   :  { %v2323_v20 = vadd.f32 %v2322_v16, %v2321_v15  ;;  %v2334_v21 = vadd.f32 %v2333_v19, %v2332_v10 }
 0x82c   :  { %v2324_v23 = vrot.slane %v2323_v20, 4  ;;  %v2336_v24 = vadd.f32 %v2335_v22, %v2334_v21 }
 0x82e   :  { %v2325_v25 = vadd.f32 %v2324_v23, %v2323_v20  ;;  %v2337_v26 = vrot.slane %v2336_v24, 4 }
 0x830   :  { %v2326_v31 = vrot.slane %v2325_v25, 2  ;;  %v2338_v27 = vadd.f32 %v2337_v26, %v2336_v24 }
 0x832   :  { %v2327_v28 = vadd.f32 %v2326_v31, %v2325_v25  ;;  %v2339_v29 = vrot.slane %v2338_v27, 2 }
 0x834   :  { %v2328_v18 = vrot.slane %v2327_v28, 1  ;;  %v2340_v30 = vadd.f32 %v2339_v29, %v2338_v27 }
 0x836   :  { %v2329_v32 = vadd.f32 %v2328_v18, %v2327_v28  ;;  %v2341_v33 = vrot.slane %v2340_v30, 1 }
 0x838   :  { %v2343_v34 = vmul.f32 0.001953125, %v2329_v32  ;;  %v2342_v35 = vadd.f32 %v2341_v33, %v2340_v30 }
 0x83a   :  { %v2345_v36 = vmul.f32 %v2343_v34, %v2343_v34  ;;  %v2344_v37 = vmul.f32 0.001953125, %v2342_v35 }
 0x83c   :  { %v2346_v38 = vsub.f32 %v2344_v37, %v2345_v36 }
 0x83e   :  { %v2347_v39 = vmax.f32 %v2346_v38, 0.0 }
 0x840   :  { %v2348_v40 = vadd.f32 1e-05, %v2347_v39 }
 0x842   :  { %3614 = vrsqrt.f32 %v2348_v40 }
 0x84c   :  { %v3615_v42 = vpop.eup %3614 }
 0x84d   :  { %v2351_v43 = vmul.f32 %v3615_v42, %v2350_v41 }
 0x84f   :  { %3307 = vmatmul.mubr.msk.f32.vlgmr.msra.gmra.mrb[32].mxu1 %vm1349_vm5, %v2351_v43  ;;  %v2353_v45 = vmul.f32 %v2351_v43, %v2343_v34 }
 0x850   :  { %3310 = vmatpush3.msk.msra.mxu1 %vm1392_vm3, %v2355_v8  ;;  %3311 = vmatprep.mubr.msk.f32.mxu1 %vm3617_vm4, %v3616_v17 }
 0x851   :  { %v2354_v46 = vsub.f32 %v2352_v44, %v2353_v45 }
 0x853   :  { %3312 = vmatmul.mubr.msk.f32.vlgmr.msra.gmra.mrb[34].mxu1 %vm1349_vm5, %v2354_v46 }
 0x922   :  { %v2428_v47 = vpop.f32.mrb[32].mxu1 }
 0x923   :  { %v2508_v49 = vrot.slane %v2428_v47, %v4183_v48  ;;  %v3308_v50 = vpop.f32.mrb[33].mxu1 }
 0x925   :  { %v2509_v51 = vmul.f32 %v2508_v49, %v4272_v59  ;;  %v2510_v52 = vmul.f32 %v4270_v58, %v2508_v49  ;;  %v2511_v56 = vmul.f32 %v2508_v49, %v4285_v63  ;;  %v2512_v57 = vmul.f32 %v4282_v62, %v2508_v49 }
 0x926   :  { %v2501_v60 = vpop.f32.mrb[34].mxu1 }
 0x927   :  { %v2516_v61 = vrot.slane %v2501_v60, %v4183_v48  ;;  %v3313_v6 = vpop.f32.mrb[35].mxu1 }
 0x929   :  { %v2517_v17 = vadd.f32 %v2516_v61, %v2509_v51  ;;  %v2518_v7 = vadd.f32 %v2516_v61, %v2510_v52  ;;  %v2519_v8 = vadd.f32 %v2516_v61, %v2511_v56  ;;  %v2520_v53 = vadd.f32 %v2516_v61, %v2512_v57 }
 0x92b   :  { %v2521_v54 = vmax.f32 %v2517_v17, 0.0  ;;  %v2522_v55 = vmax.f32 %v2518_v7, 0.0  ;;  %v2523_v0 = vmax.f32 %v2519_v8, 0.0  ;;  %v2524_v1 = vmax.f32 %v2520_v53, 0.0 }
 0x92d   :  { %2525 = vst.msk [vmem:[%s4362_s16] sm:$0xff] %vm263_vm2, %v2521_v54  ;;  %2526 = vst.msk [vmem:[%s4362_s16 + $0x8] sm:$0xff] %vm263_vm2, %v2522_v55 }
 0x92e   :  { %2527 = vst.msk [vmem:[%s4362_s16 + $0x10] sm:$0xff] %vm263_vm2, %v2523_v0  ;;  %2528 = vst.msk [vmem:[%s4362_s16 + $0x18] sm:$0xff] %vm263_vm2, %v2524_v1 }

</bundles_post_ra>
